<compile_context>
chip_gen: v6e
topology: v6e:2x2x1
jax: 0.10.0
libtpu: 0.0.40
codegen_flags: <defaults>
</compile_context>

<pallas_src>
import functools

import jax
import jax.numpy as jnp
import numpy as np
from jax import lax
from jax.experimental import pallas as pl
from jax.experimental.pallas import tpu as pltpu

S, B, C = 13, 5, 20            # cell_idx is hard-coded to 13 in the torch module
D = 5 + C
R_IMG = S * S * B              # 845 rows per image
LANES = 128
SUB = (R_IMG + LANES - 1) // LANES   # 7 sublane-rows per image
R_IMG_PAD = SUB * LANES              # 896 (845 rows + 51 zero-padded rows)

_ANCHORS_NP = np.array(
    [[0.0, 0.0, 1.3221, 1.73145],
     [0.0, 0.0, 3.19275, 4.00944],
     [0.0, 0.0, 5.05587, 8.09892],
     [0.0, 0.0, 9.47112, 4.84053],
     [0.0, 0.0, 11.2364, 10.0071]], dtype=np.float32)
ANCHORS = jnp.asarray(_ANCHORS_NP)


def _per_image_constants():
    """Trace-time (5, 7, 128) pattern: cell_x, cell_y, anc_w, anc_h, row_valid."""
    p = np.arange(R_IMG_PAD)
    b = p % B
    sx = (p // B) % S
    sy = (p // (B * S)) % S
    cx = sx.astype(np.float32).reshape(SUB, LANES)
    cy = sy.astype(np.float32).reshape(SUB, LANES)
    aw = _ANCHORS_NP[b, 2].reshape(SUB, LANES)
    ah = _ANCHORS_NP[b, 3].reshape(SUB, LANES)
    rv = (p < R_IMG).astype(np.float32).reshape(SUB, LANES)
    return np.stack([cx, cy, aw, ah, rv], axis=0).astype(np.float32)


def _sig(x):
    # sigmoid as a single EUP tanh (no exp + full-precision divide)
    return 0.5 * (jnp.tanh(0.5 * x) + 1.0)


def _yolo_loss_kernel(pred_ref, targ_ref, aux_ref, out_ref, *,
                      n_images, tile_imgs, inv_rows):
    """One tile of `tile_imgs` images; writes a per-tile partial loss sum.

    pred_ref / targ_ref : (D, tile_imgs, 7, 128) field-major f32.
    aux_ref             : (5, 7, 128) constant pattern (cell/anchor/row-valid).
    out_ref             : (1, 8, 128) block holding the partial sum (broadcast).
    """
    pid = pl.program_id(0)
    cx = aux_ref[0]
    cy = aux_ref[1]
    aw = aux_ref[2]
    ah = aux_ref[3]
    rv = aux_ref[4]

    def img_body(i, acc):
        px = pred_ref[0, i]
        py = pred_ref[1, i]
        pw = pred_ref[2, i]
        ph = pred_ref[3, i]
        pconf = pred_ref[4, i]
        tx = targ_ref[0, i]
        ty = targ_ref[1, i]
        tw = targ_ref[2, i]
        th = targ_ref[3, i]
        ex = targ_ref[4, i]                      # objectness mask

        # decoded boxes; mask exp args so non-object rows never produce inf*0
        bx = ex * (_sig(px) + cx)
        by = ex * (_sig(py) + cy)
        ex2 = ex * ex                            # module multiplies exist twice
        bw = ex2 * aw * jnp.exp(jnp.where(ex > 0.0, pw, 0.0))
        bh = ex2 * ah * jnp.exp(jnp.where(ex > 0.0, ph, 0.0))

        # IoU (midpoint box format); exact divide to keep the 0.6 threshold exact
        b1x1, b1x2 = bx - 0.5 * bw, bx + 0.5 * bw
        b1y1, b1y2 = by - 0.5 * bh, by + 0.5 * bh
        b2x1, b2x2 = tx - 0.5 * tw, tx + 0.5 * tw
        b2y1, b2y2 = ty - 0.5 * th, ty + 0.5 * th
        inter = (jnp.maximum(jnp.minimum(b1x2, b2x2) - jnp.maximum(b1x1, b2x1), 0.0)
                 * jnp.maximum(jnp.minimum(b1y2, b2y2) - jnp.maximum(b1y1, b2y1), 0.0))
        area1 = jnp.abs((b1x2 - b1x1) * (b1y2 - b1y1))
        area2 = jnp.abs((b2x2 - b2x1) * (b2y2 - b2y1))
        ious = inter / (area1 + area2 - inter + 1e-6)

        xy = (bx - tx) ** 2 + (by - ty) ** 2
        wh = ((jnp.sqrt(jnp.abs(bw) + 1e-32) - jnp.sqrt(jnp.abs(tw) + 1e-32)) ** 2
              + (jnp.sqrt(jnp.abs(bh) + 1e-32) - jnp.sqrt(jnp.abs(th) + 1e-32)) ** 2)
        obj = (ex - ex * ious * _sig(ex * pconf)) ** 2

        # only the no-obj term is non-zero on padded rows / padded images
        img_ok = (pid * tile_imgs + i) < n_images
        valid = jnp.where(img_ok, rv, 0.0)
        ind = (ious < 0.6).astype(jnp.float32)
        noobj = ((1.0 - ex) - (1.0 - ex) * (1.0 - _sig(pconf)) * ind) ** 2 * valid

        # class loss: two passes over the C logit planes, no (C, rows) temporary
        m = pred_ref[5, i]
        tmax = targ_ref[5, i]
        for c in range(1, C):
            m = jnp.maximum(m, pred_ref[5 + c, i])
            tmax = jnp.maximum(tmax, targ_ref[5 + c, i])
        s = jnp.zeros_like(m)
        picked = jnp.zeros_like(m)
        found = jnp.zeros_like(m)
        for c in range(C):
            lc = pred_ref[5 + c, i]
            tc = targ_ref[5 + c, i]
            s = s + jnp.exp(lc - m)
            hit = jnp.logical_and(tc >= tmax, found < 0.5)   # first-max tie-break
            picked = jnp.where(hit, lc, picked)
            found = jnp.where(hit, 1.0, found)
        cls = ex * (m + jnp.log(s) - picked)     # ex-masked NLL at target argmax

        per_row = 5.0 * xy + 5.0 * wh + obj + noobj + cls * inv_rows
        return acc + per_row

    acc = lax.fori_loop(0, tile_imgs, img_body,
                        jnp.zeros((SUB, LANES), jnp.float32))
    out_ref[...] = jnp.zeros((1, 8, LANES), jnp.float32) + jnp.sum(acc)


@jax.jit
def yolo_v2_loss(predictions, target):
    """predictions, target: (N, S, S, B, 5+C) float32. Returns scalar loss."""
    N = predictions.shape[0]
    # images per grid step: keep >= 2 grid steps whenever N >= 2 (v7x megacore),
    # cap at 16 images (~1.4 MiB / operand / step) to amortize pipeline overhead.
    tile_imgs = int(max(1, min(16, N // 2)))
    num_tiles = -(-N // tile_imgs)
    n_pad = num_tiles * tile_imgs

    def to_field_major(x):
        x = x.reshape(N, R_IMG, D).astype(jnp.float32)
        x = jnp.transpose(x, (2, 0, 1))                              # (D, N, 845)
        x = jnp.pad(x, ((0, 0), (0, n_pad - N), (0, R_IMG_PAD - R_IMG)))
        return x.reshape(D, n_pad, SUB, LANES)                       # (D, N_pad, 7, 128)

    pred_fm = to_field_major(predictions)
    targ_fm = to_field_major(target)
    aux_const = jnp.asarray(_per_image_constants())                  # (5, 7, 128)

    kernel = functools.partial(
        _yolo_loss_kernel,
        n_images=N, tile_imgs=tile_imgs, inv_rows=1.0 / float(N * R_IMG))

    partials = pl.pallas_call(
        kernel,
        out_shape=jax.ShapeDtypeStruct((num_tiles, 8, LANES), jnp.float32),
        grid_spec=pltpu.PrefetchScalarGridSpec(
            num_scalar_prefetch=0,
            grid=(num_tiles,),
            in_specs=[
                pl.BlockSpec((D, tile_imgs, SUB, LANES), lambda i: (0, i, 0, 0)),
                pl.BlockSpec((D, tile_imgs, SUB, LANES), lambda i: (0, i, 0, 0)),
                pl.BlockSpec((5, SUB, LANES), lambda i: (0, 0, 0)),
            ],
            out_specs=pl.BlockSpec((1, 8, LANES), lambda i: (i, 0, 0)),
        ),
        compiler_params=pltpu.CompilerParams(
            dimension_semantics=("parallel",),
            allow_input_fusion=[True, True, False]),
        cost_estimate=pl.CostEstimate(
            flops=260 * n_pad * R_IMG_PAD,
            transcendentals=30 * n_pad * R_IMG_PAD,
            bytes_accessed=2 * D * 4 * n_pad * R_IMG_PAD
                           + 5 * SUB * LANES * 4
                           + num_tiles * 8 * LANES * 4),
    )(pred_fm, targ_fm, aux_const)
    return jnp.sum(partials[:, 0, 0])


def yolo_v2_loss_ref(predictions, target):
    """Pure-JAX mirror of the PyTorch forward (for verification)."""
    exist = target[..., 4:5]
    cell = jnp.arange(13, dtype=predictions.dtype)
    bx = exist * (1 / (1 + jnp.exp(-predictions[..., 0:1]))) + exist * cell.reshape(1, 1, -1, 1, 1)
    by = exist * (1 / (1 + jnp.exp(-predictions[..., 1:2]))) + exist * cell.reshape(1, -1, 1, 1, 1)
    bw = exist * ANCHORS[:, 2].reshape(1, 1, 1, -1, 1) * exist * jnp.exp(predictions[..., 2:3])
    bh = exist * ANCHORS[:, 3].reshape(1, 1, 1, -1, 1) * exist * jnp.exp(predictions[..., 3:4])

    b1x1, b1y1, b1x2, b1y2 = bx - bw / 2, by - bh / 2, bx + bw / 2, by + bh / 2
    tb = target[..., :4]
    b2x1 = tb[..., 0:1] - tb[..., 2:3] / 2
    b2y1 = tb[..., 1:2] - tb[..., 3:4] / 2
    b2x2 = tb[..., 0:1] + tb[..., 2:3] / 2
    b2y2 = tb[..., 1:2] + tb[..., 3:4] / 2
    inter = (jnp.maximum(jnp.minimum(b1x2, b2x2) - jnp.maximum(b1x1, b2x1), 0)
             * jnp.maximum(jnp.minimum(b1y2, b2y2) - jnp.maximum(b1y1, b2y1), 0))
    a1 = jnp.abs((b1x2 - b1x1) * (b1y2 - b1y1))
    a2 = jnp.abs((b2x2 - b2x1) * (b2y2 - b2y1))
    ious = inter / (a1 + a2 - inter + 1e-6)

    sig = lambda x: 1 / (1 + jnp.exp(-x))
    mse = lambda a, b: jnp.sum((a - b) ** 2)
    xy = mse(jnp.concatenate([bx, by], -1), target[..., :2])
    wh = mse(jnp.sqrt(jnp.abs(jnp.concatenate([bw, bh], -1)) + 1e-32),
             jnp.sqrt(jnp.abs(target[..., 2:4]) + 1e-32))
    obj = mse(exist, exist * ious * sig(exist * predictions[..., 4:5]))
    noobj = mse(1 - exist,
                (1 - exist) * (1 - sig(predictions[..., 4:5]))
                * (jnp.max(ious, -1) < 0.6).astype(predictions.dtype)[..., None])
    logsm = jax.nn.log_softmax(predictions[..., 5:], axis=-1)
    masked = (exist * logsm).reshape(-1, predictions.shape[-1] - 5)
    idx = jnp.argmax(target[..., 5:].reshape(-1, predictions.shape[-1] - 5), -1)
    class_loss = jnp.mean(-jnp.take_along_axis(masked, idx[:, None], axis=-1))
    return 5 * xy + 5 * wh + obj + noobj + class_loss


if __name__ == "__main__":
    key = jax.random.PRNGKey(0)
    k1, k2, k3 = jax.random.split(key, 3)
    N = 2  # small batch; S=13, B=5, C=20 fixed by the module's defaults

    predictions = 0.5 * jax.random.normal(k1, (N, S, S, B, D), dtype=jnp.float32)
    target = jax.random.uniform(k2, (N, S, S, B, D), dtype=jnp.float32)
    # make channel 4 a 0/1 objectness mask
    mask = (jax.random.uniform(k3, (N, S, S, B)) > 0.7).astype(jnp.float32)
    target = target.at[..., 4].set(mask)

    loss = jax.block_until_ready(yolo_v2_loss(predictions, target))
    ref = jax.block_until_ready(yolo_v2_loss_ref(predictions, target))
    np.testing.assert_allclose(np.asarray(loss), np.asarray(ref), rtol=2e-3, atol=1e-2)
    print("KERNEL_OK")
</pallas_src>

<mosaic_0001>
module attributes {stable_mosaic.version = 11 : i64} {
  func.func @_yolo_loss_kernel(%arg0: i32, %arg1: memref<25x1x7x128xf32, #tpu.memory_space<vmem>>, %arg2: memref<25x1x7x128xf32, #tpu.memory_space<vmem>>, %arg3: memref<5x7x128xf32, #tpu.memory_space<vmem>>, %arg4: memref<1x8x128xf32, #tpu.memory_space<vmem>>) attributes {dimension_semantics = [#tpu.dimension_semantics<parallel>], iteration_bounds = array<i64: 2>, scalar_prefetch = 0 : i64, scratch_operands = 0 : i64, tpu.core_type = #tpu.core_type<tc>, window_params = [{transform_indices = @transform_0, window_bounds = array<i64: 25, 1, 7, 128>}, {transform_indices = @transform_1, window_bounds = array<i64: 25, 1, 7, 128>}, {pipeline_mode = #tpu.pipeline_mode<synchronous>, transform_indices = @transform_2, window_bounds = array<i64: 5, 7, 128>}, {transform_indices = @transform_3, window_bounds = array<i64: 1, 8, 128>}]} {
    %c0 = arith.constant 0 : index
    %c0_0 = arith.constant 0 : index
    %c0_1 = arith.constant 0 : index
    %0 = vector.load %arg3[%c0, %c0_0, %c0_1] : memref<5x7x128xf32, #tpu.memory_space<vmem>>, vector<1x7x128xf32>
    %1 = vector.shape_cast %0 : vector<1x7x128xf32> to vector<7x128xf32>
    %c1 = arith.constant 1 : index
    %c0_2 = arith.constant 0 : index
    %c0_3 = arith.constant 0 : index
    %2 = vector.load %arg3[%c1, %c0_2, %c0_3] : memref<5x7x128xf32, #tpu.memory_space<vmem>>, vector<1x7x128xf32>
    %3 = vector.shape_cast %2 : vector<1x7x128xf32> to vector<7x128xf32>
    %c2 = arith.constant 2 : index
    %c0_4 = arith.constant 0 : index
    %c0_5 = arith.constant 0 : index
    %4 = vector.load %arg3[%c2, %c0_4, %c0_5] : memref<5x7x128xf32, #tpu.memory_space<vmem>>, vector<1x7x128xf32>
    %5 = vector.shape_cast %4 : vector<1x7x128xf32> to vector<7x128xf32>
    %c3 = arith.constant 3 : index
    %c0_6 = arith.constant 0 : index
    %c0_7 = arith.constant 0 : index
    %6 = vector.load %arg3[%c3, %c0_6, %c0_7] : memref<5x7x128xf32, #tpu.memory_space<vmem>>, vector<1x7x128xf32>
    %7 = vector.shape_cast %6 : vector<1x7x128xf32> to vector<7x128xf32>
    %c4 = arith.constant 4 : index
    %c0_8 = arith.constant 0 : index
    %c0_9 = arith.constant 0 : index
    %8 = vector.load %arg3[%c4, %c0_8, %c0_9] : memref<5x7x128xf32, #tpu.memory_space<vmem>>, vector<1x7x128xf32>
    %9 = vector.shape_cast %8 : vector<1x7x128xf32> to vector<7x128xf32>
    %cst = arith.constant 0.000000e+00 : f32
    %10 = vector.broadcast %cst : f32 to vector<7x128xf32>
    %c0_i32 = arith.constant 0 : i32
    %c0_10 = arith.constant 0 : index
    %11 = arith.index_cast %c0_i32 : i32 to index
    %c0_11 = arith.constant 0 : index
    %c0_12 = arith.constant 0 : index
    %12 = vector.load %arg1[%c0_10, %11, %c0_11, %c0_12] : memref<25x1x7x128xf32, #tpu.memory_space<vmem>>, vector<1x1x7x128xf32>
    %13 = vector.shape_cast %12 : vector<1x1x7x128xf32> to vector<7x128xf32>
    %c1_13 = arith.constant 1 : index
    %14 = arith.index_cast %c0_i32 : i32 to index
    %c0_14 = arith.constant 0 : index
    %c0_15 = arith.constant 0 : index
    %15 = vector.load %arg1[%c1_13, %14, %c0_14, %c0_15] : memref<25x1x7x128xf32, #tpu.memory_space<vmem>>, vector<1x1x7x128xf32>
    %16 = vector.shape_cast %15 : vector<1x1x7x128xf32> to vector<7x128xf32>
    %c2_16 = arith.constant 2 : index
    %17 = arith.index_cast %c0_i32 : i32 to index
    %c0_17 = arith.constant 0 : index
    %c0_18 = arith.constant 0 : index
    %18 = vector.load %arg1[%c2_16, %17, %c0_17, %c0_18] : memref<25x1x7x128xf32, #tpu.memory_space<vmem>>, vector<1x1x7x128xf32>
    %19 = vector.shape_cast %18 : vector<1x1x7x128xf32> to vector<7x128xf32>
    %c3_19 = arith.constant 3 : index
    %20 = arith.index_cast %c0_i32 : i32 to index
    %c0_20 = arith.constant 0 : index
    %c0_21 = arith.constant 0 : index
    %21 = vector.load %arg1[%c3_19, %20, %c0_20, %c0_21] : memref<25x1x7x128xf32, #tpu.memory_space<vmem>>, vector<1x1x7x128xf32>
    %22 = vector.shape_cast %21 : vector<1x1x7x128xf32> to vector<7x128xf32>
    %c4_22 = arith.constant 4 : index
    %23 = arith.index_cast %c0_i32 : i32 to index
    %c0_23 = arith.constant 0 : index
    %c0_24 = arith.constant 0 : index
    %24 = vector.load %arg1[%c4_22, %23, %c0_23, %c0_24] : memref<25x1x7x128xf32, #tpu.memory_space<vmem>>, vector<1x1x7x128xf32>
    %25 = vector.shape_cast %24 : vector<1x1x7x128xf32> to vector<7x128xf32>
    %c0_25 = arith.constant 0 : index
    %26 = arith.index_cast %c0_i32 : i32 to index
    %c0_26 = arith.constant 0 : index
    %c0_27 = arith.constant 0 : index
    %27 = vector.load %arg2[%c0_25, %26, %c0_26, %c0_27] : memref<25x1x7x128xf32, #tpu.memory_space<vmem>>, vector<1x1x7x128xf32>
    %28 = vector.shape_cast %27 : vector<1x1x7x128xf32> to vector<7x128xf32>
    %c1_28 = arith.constant 1 : index
    %29 = arith.index_cast %c0_i32 : i32 to index
    %c0_29 = arith.constant 0 : index
    %c0_30 = arith.constant 0 : index
    %30 = vector.load %arg2[%c1_28, %29, %c0_29, %c0_30] : memref<25x1x7x128xf32, #tpu.memory_space<vmem>>, vector<1x1x7x128xf32>
    %31 = vector.shape_cast %30 : vector<1x1x7x128xf32> to vector<7x128xf32>
    %c2_31 = arith.constant 2 : index
    %32 = arith.index_cast %c0_i32 : i32 to index
    %c0_32 = arith.constant 0 : index
    %c0_33 = arith.constant 0 : index
    %33 = vector.load %arg2[%c2_31, %32, %c0_32, %c0_33] : memref<25x1x7x128xf32, #tpu.memory_space<vmem>>, vector<1x1x7x128xf32>
    %34 = vector.shape_cast %33 : vector<1x1x7x128xf32> to vector<7x128xf32>
    %c3_34 = arith.constant 3 : index
    %35 = arith.index_cast %c0_i32 : i32 to index
    %c0_35 = arith.constant 0 : index
    %c0_36 = arith.constant 0 : index
    %36 = vector.load %arg2[%c3_34, %35, %c0_35, %c0_36] : memref<25x1x7x128xf32, #tpu.memory_space<vmem>>, vector<1x1x7x128xf32>
    %37 = vector.shape_cast %36 : vector<1x1x7x128xf32> to vector<7x128xf32>
    %c4_37 = arith.constant 4 : index
    %38 = arith.index_cast %c0_i32 : i32 to index
    %c0_38 = arith.constant 0 : index
    %c0_39 = arith.constant 0 : index
    %39 = vector.load %arg2[%c4_37, %38, %c0_38, %c0_39] : memref<25x1x7x128xf32, #tpu.memory_space<vmem>>, vector<1x1x7x128xf32>
    %40 = vector.shape_cast %39 : vector<1x1x7x128xf32> to vector<7x128xf32>
    %cst_40 = arith.constant 5.000000e-01 : f32
    %41 = vector.broadcast %cst_40 : f32 to vector<7x128xf32>
    %42 = arith.mulf %41, %13 : vector<7x128xf32>
    %43 = math.tanh %42 : vector<7x128xf32>
    %cst_41 = arith.constant 1.000000e+00 : f32
    %44 = vector.broadcast %cst_41 : f32 to vector<7x128xf32>
    %45 = arith.addf %43, %44 : vector<7x128xf32>
    %cst_42 = arith.constant 5.000000e-01 : f32
    %46 = vector.broadcast %cst_42 : f32 to vector<7x128xf32>
    %47 = arith.mulf %46, %45 : vector<7x128xf32>
    %48 = arith.addf %47, %1 : vector<7x128xf32>
    %49 = arith.mulf %40, %48 : vector<7x128xf32>
    %cst_43 = arith.constant 5.000000e-01 : f32
    %50 = vector.broadcast %cst_43 : f32 to vector<7x128xf32>
    %51 = arith.mulf %50, %16 : vector<7x128xf32>
    %52 = math.tanh %51 : vector<7x128xf32>
    %cst_44 = arith.constant 1.000000e+00 : f32
    %53 = vector.broadcast %cst_44 : f32 to vector<7x128xf32>
    %54 = arith.addf %52, %53 : vector<7x128xf32>
    %cst_45 = arith.constant 5.000000e-01 : f32
    %55 = vector.broadcast %cst_45 : f32 to vector<7x128xf32>
    %56 = arith.mulf %55, %54 : vector<7x128xf32>
    %57 = arith.addf %56, %3 : vector<7x128xf32>
    %58 = arith.mulf %40, %57 : vector<7x128xf32>
    %59 = arith.mulf %40, %40 : vector<7x128xf32>
    %60 = arith.mulf %59, %5 : vector<7x128xf32>
    %cst_46 = arith.constant 0.000000e+00 : f32
    %61 = vector.broadcast %cst_46 : f32 to vector<7x128xf32>
    %62 = arith.cmpf ogt, %40, %61 : vector<7x128xf32>
    %cst_47 = arith.constant 0.000000e+00 : f32
    %63 = vector.broadcast %cst_47 : f32 to vector<7x128xf32>
    %64 = arith.select %62, %19, %63 : vector<7x128xi1>, vector<7x128xf32>
    %65 = math.exp %64 : vector<7x128xf32>
    %66 = arith.mulf %60, %65 : vector<7x128xf32>
    %67 = arith.mulf %59, %7 : vector<7x128xf32>
    %cst_48 = arith.constant 0.000000e+00 : f32
    %68 = vector.broadcast %cst_48 : f32 to vector<7x128xf32>
    %69 = arith.cmpf ogt, %40, %68 : vector<7x128xf32>
    %cst_49 = arith.constant 0.000000e+00 : f32
    %70 = vector.broadcast %cst_49 : f32 to vector<7x128xf32>
    %71 = arith.select %69, %22, %70 : vector<7x128xi1>, vector<7x128xf32>
    %72 = math.exp %71 : vector<7x128xf32>
    %73 = arith.mulf %67, %72 : vector<7x128xf32>
    %cst_50 = arith.constant 5.000000e-01 : f32
    %74 = vector.broadcast %cst_50 : f32 to vector<7x128xf32>
    %75 = arith.mulf %74, %66 : vector<7x128xf32>
    %76 = arith.subf %49, %75 : vector<7x128xf32>
    %cst_51 = arith.constant 5.000000e-01 : f32
    %77 = vector.broadcast %cst_51 : f32 to vector<7x128xf32>
    %78 = arith.mulf %77, %66 : vector<7x128xf32>
    %79 = arith.addf %49, %78 : vector<7x128xf32>
    %cst_52 = arith.constant 5.000000e-01 : f32
    %80 = vector.broadcast %cst_52 : f32 to vector<7x128xf32>
    %81 = arith.mulf %80, %73 : vector<7x128xf32>
    %82 = arith.subf %58, %81 : vector<7x128xf32>
    %cst_53 = arith.constant 5.000000e-01 : f32
    %83 = vector.broadcast %cst_53 : f32 to vector<7x128xf32>
    %84 = arith.mulf %83, %73 : vector<7x128xf32>
    %85 = arith.addf %58, %84 : vector<7x128xf32>
    %cst_54 = arith.constant 5.000000e-01 : f32
    %86 = vector.broadcast %cst_54 : f32 to vector<7x128xf32>
    %87 = arith.mulf %86, %34 : vector<7x128xf32>
    %88 = arith.subf %28, %87 : vector<7x128xf32>
    %cst_55 = arith.constant 5.000000e-01 : f32
    %89 = vector.broadcast %cst_55 : f32 to vector<7x128xf32>
    %90 = arith.mulf %89, %34 : vector<7x128xf32>
    %91 = arith.addf %28, %90 : vector<7x128xf32>
    %cst_56 = arith.constant 5.000000e-01 : f32
    %92 = vector.broadcast %cst_56 : f32 to vector<7x128xf32>
    %93 = arith.mulf %92, %37 : vector<7x128xf32>
    %94 = arith.subf %31, %93 : vector<7x128xf32>
    %cst_57 = arith.constant 5.000000e-01 : f32
    %95 = vector.broadcast %cst_57 : f32 to vector<7x128xf32>
    %96 = arith.mulf %95, %37 : vector<7x128xf32>
    %97 = arith.addf %31, %96 : vector<7x128xf32>
    %98 = arith.minimumf %79, %91 : vector<7x128xf32>
    %99 = arith.maximumf %76, %88 : vector<7x128xf32>
    %100 = arith.subf %98, %99 : vector<7x128xf32>
    %cst_58 = arith.constant 0.000000e+00 : f32
    %101 = vector.broadcast %cst_58 : f32 to vector<7x128xf32>
    %102 = arith.maximumf %100, %101 : vector<7x128xf32>
    %103 = arith.minimumf %85, %97 : vector<7x128xf32>
    %104 = arith.maximumf %82, %94 : vector<7x128xf32>
    %105 = arith.subf %103, %104 : vector<7x128xf32>
    %cst_59 = arith.constant 0.000000e+00 : f32
    %106 = vector.broadcast %cst_59 : f32 to vector<7x128xf32>
    %107 = arith.maximumf %105, %106 : vector<7x128xf32>
    %108 = arith.mulf %102, %107 : vector<7x128xf32>
    %109 = arith.subf %79, %76 : vector<7x128xf32>
    %110 = arith.subf %85, %82 : vector<7x128xf32>
    %111 = arith.mulf %109, %110 : vector<7x128xf32>
    %112 = math.absf %111 : vector<7x128xf32>
    %113 = arith.subf %91, %88 : vector<7x128xf32>
    %114 = arith.subf %97, %94 : vector<7x128xf32>
    %115 = arith.mulf %113, %114 : vector<7x128xf32>
    %116 = math.absf %115 : vector<7x128xf32>
    %117 = arith.addf %112, %116 : vector<7x128xf32>
    %118 = arith.subf %117, %108 : vector<7x128xf32>
    %cst_60 = arith.constant 9.99999997E-7 : f32
    %119 = vector.broadcast %cst_60 : f32 to vector<7x128xf32>
    %120 = arith.addf %118, %119 : vector<7x128xf32>
    %121 = arith.divf %108, %120 : vector<7x128xf32>
    %122 = arith.subf %49, %28 : vector<7x128xf32>
    %123 = arith.mulf %122, %122 : vector<7x128xf32>
    %124 = arith.subf %58, %31 : vector<7x128xf32>
    %125 = arith.mulf %124, %124 : vector<7x128xf32>
    %126 = arith.addf %123, %125 : vector<7x128xf32>
    %127 = math.absf %66 : vector<7x128xf32>
    %cst_61 = arith.constant 1.000000e-32 : f32
    %128 = vector.broadcast %cst_61 : f32 to vector<7x128xf32>
    %129 = arith.addf %127, %128 : vector<7x128xf32>
    %130 = math.sqrt %129 : vector<7x128xf32>
    %131 = math.absf %34 : vector<7x128xf32>
    %cst_62 = arith.constant 1.000000e-32 : f32
    %132 = vector.broadcast %cst_62 : f32 to vector<7x128xf32>
    %133 = arith.addf %131, %132 : vector<7x128xf32>
    %134 = math.sqrt %133 : vector<7x128xf32>
    %135 = arith.subf %130, %134 : vector<7x128xf32>
    %136 = arith.mulf %135, %135 : vector<7x128xf32>
    %137 = math.absf %73 : vector<7x128xf32>
    %cst_63 = arith.constant 1.000000e-32 : f32
    %138 = vector.broadcast %cst_63 : f32 to vector<7x128xf32>
    %139 = arith.addf %137, %138 : vector<7x128xf32>
    %140 = math.sqrt %139 : vector<7x128xf32>
    %141 = math.absf %37 : vector<7x128xf32>
    %cst_64 = arith.constant 1.000000e-32 : f32
    %142 = vector.broadcast %cst_64 : f32 to vector<7x128xf32>
    %143 = arith.addf %141, %142 : vector<7x128xf32>
    %144 = math.sqrt %143 : vector<7x128xf32>
    %145 = arith.subf %140, %144 : vector<7x128xf32>
    %146 = arith.mulf %145, %145 : vector<7x128xf32>
    %147 = arith.addf %136, %146 : vector<7x128xf32>
    %148 = arith.mulf %40, %121 : vector<7x128xf32>
    %149 = arith.mulf %40, %25 : vector<7x128xf32>
    %cst_65 = arith.constant 5.000000e-01 : f32
    %150 = vector.broadcast %cst_65 : f32 to vector<7x128xf32>
    %151 = arith.mulf %150, %149 : vector<7x128xf32>
    %152 = math.tanh %151 : vector<7x128xf32>
    %cst_66 = arith.constant 1.000000e+00 : f32
    %153 = vector.broadcast %cst_66 : f32 to vector<7x128xf32>
    %154 = arith.addf %152, %153 : vector<7x128xf32>
    %cst_67 = arith.constant 5.000000e-01 : f32
    %155 = vector.broadcast %cst_67 : f32 to vector<7x128xf32>
    %156 = arith.mulf %155, %154 : vector<7x128xf32>
    %157 = arith.mulf %148, %156 : vector<7x128xf32>
    %158 = arith.subf %40, %157 : vector<7x128xf32>
    %159 = arith.mulf %158, %158 : vector<7x128xf32>
    %c1_i32 = arith.constant 1 : i32
    %160 = arith.muli %arg0, %c1_i32 : i32
    %161 = arith.addi %160, %c0_i32 : i32
    %c2_i32 = arith.constant 2 : i32
    %162 = arith.cmpi slt, %161, %c2_i32 : i32
    %cst_68 = arith.constant 0.000000e+00 : f32
    %163 = vector.broadcast %cst_68 : f32 to vector<7x128xf32>
    %164 = arith.select %162, %9, %163 : vector<7x128xf32>
    %cst_69 = arith.constant 6.000000e-01 : f32
    %165 = vector.broadcast %cst_69 : f32 to vector<7x128xf32>
    %166 = arith.cmpf olt, %121, %165 : vector<7x128xf32>
    %167 = arith.extui %166 : vector<7x128xi1> to vector<7x128xi32>
    %168 = arith.sitofp %167 : vector<7x128xi32> to vector<7x128xf32>
    %cst_70 = arith.constant 1.000000e+00 : f32
    %169 = vector.broadcast %cst_70 : f32 to vector<7x128xf32>
    %170 = arith.subf %169, %40 : vector<7x128xf32>
    %cst_71 = arith.constant 1.000000e+00 : f32
    %171 = vector.broadcast %cst_71 : f32 to vector<7x128xf32>
    %172 = arith.subf %171, %40 : vector<7x128xf32>
    %cst_72 = arith.constant 5.000000e-01 : f32
    %173 = vector.broadcast %cst_72 : f32 to vector<7x128xf32>
    %174 = arith.mulf %173, %25 : vector<7x128xf32>
    %175 = math.tanh %174 : vector<7x128xf32>
    %cst_73 = arith.constant 1.000000e+00 : f32
    %176 = vector.broadcast %cst_73 : f32 to vector<7x128xf32>
    %177 = arith.addf %175, %176 : vector<7x128xf32>
    %cst_74 = arith.constant 5.000000e-01 : f32
    %178 = vector.broadcast %cst_74 : f32 to vector<7x128xf32>
    %179 = arith.mulf %178, %177 : vector<7x128xf32>
    %cst_75 = arith.constant 1.000000e+00 : f32
    %180 = vector.broadcast %cst_75 : f32 to vector<7x128xf32>
    %181 = arith.subf %180, %179 : vector<7x128xf32>
    %182 = arith.mulf %172, %181 : vector<7x128xf32>
    %183 = arith.mulf %182, %168 : vector<7x128xf32>
    %184 = arith.subf %170, %183 : vector<7x128xf32>
    %185 = arith.mulf %184, %184 : vector<7x128xf32>
    %186 = arith.mulf %185, %164 : vector<7x128xf32>
    %c5 = arith.constant 5 : index
    %187 = arith.index_cast %c0_i32 : i32 to index
    %c0_76 = arith.constant 0 : index
    %c0_77 = arith.constant 0 : index
    %188 = vector.load %arg1[%c5, %187, %c0_76, %c0_77] : memref<25x1x7x128xf32, #tpu.memory_space<vmem>>, vector<1x1x7x128xf32>
    %189 = vector.shape_cast %188 : vector<1x1x7x128xf32> to vector<7x128xf32>
    %c5_78 = arith.constant 5 : index
    %190 = arith.index_cast %c0_i32 : i32 to index
    %c0_79 = arith.constant 0 : index
    %c0_80 = arith.constant 0 : index
    %191 = vector.load %arg2[%c5_78, %190, %c0_79, %c0_80] : memref<25x1x7x128xf32, #tpu.memory_space<vmem>>, vector<1x1x7x128xf32>
    %192 = vector.shape_cast %191 : vector<1x1x7x128xf32> to vector<7x128xf32>
    %c6 = arith.constant 6 : index
    %193 = arith.index_cast %c0_i32 : i32 to index
    %c0_81 = arith.constant 0 : index
    %c0_82 = arith.constant 0 : index
    %194 = vector.load %arg1[%c6, %193, %c0_81, %c0_82] : memref<25x1x7x128xf32, #tpu.memory_space<vmem>>, vector<1x1x7x128xf32>
    %195 = vector.shape_cast %194 : vector<1x1x7x128xf32> to vector<7x128xf32>
    %196 = arith.maximumf %189, %195 : vector<7x128xf32>
    %c6_83 = arith.constant 6 : index
    %197 = arith.index_cast %c0_i32 : i32 to index
    %c0_84 = arith.constant 0 : index
    %c0_85 = arith.constant 0 : index
    %198 = vector.load %arg2[%c6_83, %197, %c0_84, %c0_85] : memref<25x1x7x128xf32, #tpu.memory_space<vmem>>, vector<1x1x7x128xf32>
    %199 = vector.shape_cast %198 : vector<1x1x7x128xf32> to vector<7x128xf32>
    %200 = arith.maximumf %192, %199 : vector<7x128xf32>
    %c7 = arith.constant 7 : index
    %201 = arith.index_cast %c0_i32 : i32 to index
    %c0_86 = arith.constant 0 : index
    %c0_87 = arith.constant 0 : index
    %202 = vector.load %arg1[%c7, %201, %c0_86, %c0_87] : memref<25x1x7x128xf32, #tpu.memory_space<vmem>>, vector<1x1x7x128xf32>
    %203 = vector.shape_cast %202 : vector<1x1x7x128xf32> to vector<7x128xf32>
    %204 = arith.maximumf %196, %203 : vector<7x128xf32>
    %c7_88 = arith.constant 7 : index
    %205 = arith.index_cast %c0_i32 : i32 to index
    %c0_89 = arith.constant 0 : index
    %c0_90 = arith.constant 0 : index
    %206 = vector.load %arg2[%c7_88, %205, %c0_89, %c0_90] : memref<25x1x7x128xf32, #tpu.memory_space<vmem>>, vector<1x1x7x128xf32>
    %207 = vector.shape_cast %206 : vector<1x1x7x128xf32> to vector<7x128xf32>
    %208 = arith.maximumf %200, %207 : vector<7x128xf32>
    %c8 = arith.constant 8 : index
    %209 = arith.index_cast %c0_i32 : i32 to index
    %c0_91 = arith.constant 0 : index
    %c0_92 = arith.constant 0 : index
    %210 = vector.load %arg1[%c8, %209, %c0_91, %c0_92] : memref<25x1x7x128xf32, #tpu.memory_space<vmem>>, vector<1x1x7x128xf32>
    %211 = vector.shape_cast %210 : vector<1x1x7x128xf32> to vector<7x128xf32>
    %212 = arith.maximumf %204, %211 : vector<7x128xf32>
    %c8_93 = arith.constant 8 : index
    %213 = arith.index_cast %c0_i32 : i32 to index
    %c0_94 = arith.constant 0 : index
    %c0_95 = arith.constant 0 : index
    %214 = vector.load %arg2[%c8_93, %213, %c0_94, %c0_95] : memref<25x1x7x128xf32, #tpu.memory_space<vmem>>, vector<1x1x7x128xf32>
    %215 = vector.shape_cast %214 : vector<1x1x7x128xf32> to vector<7x128xf32>
    %216 = arith.maximumf %208, %215 : vector<7x128xf32>
    %c9 = arith.constant 9 : index
    %217 = arith.index_cast %c0_i32 : i32 to index
    %c0_96 = arith.constant 0 : index
    %c0_97 = arith.constant 0 : index
    %218 = vector.load %arg1[%c9, %217, %c0_96, %c0_97] : memref<25x1x7x128xf32, #tpu.memory_space<vmem>>, vector<1x1x7x128xf32>
    %219 = vector.shape_cast %218 : vector<1x1x7x128xf32> to vector<7x128xf32>
    %220 = arith.maximumf %212, %219 : vector<7x128xf32>
    %c9_98 = arith.constant 9 : index
    %221 = arith.index_cast %c0_i32 : i32 to index
    %c0_99 = arith.constant 0 : index
    %c0_100 = arith.constant 0 : index
    %222 = vector.load %arg2[%c9_98, %221, %c0_99, %c0_100] : memref<25x1x7x128xf32, #tpu.memory_space<vmem>>, vector<1x1x7x128xf32>
    %223 = vector.shape_cast %222 : vector<1x1x7x128xf32> to vector<7x128xf32>
    %224 = arith.maximumf %216, %223 : vector<7x128xf32>
    %c10 = arith.constant 10 : index
    %225 = arith.index_cast %c0_i32 : i32 to index
    %c0_101 = arith.constant 0 : index
    %c0_102 = arith.constant 0 : index
    %226 = vector.load %arg1[%c10, %225, %c0_101, %c0_102] : memref<25x1x7x128xf32, #tpu.memory_space<vmem>>, vector<1x1x7x128xf32>
    %227 = vector.shape_cast %226 : vector<1x1x7x128xf32> to vector<7x128xf32>
    %228 = arith.maximumf %220, %227 : vector<7x128xf32>
    %c10_103 = arith.constant 10 : index
    %229 = arith.index_cast %c0_i32 : i32 to index
    %c0_104 = arith.constant 0 : index
    %c0_105 = arith.constant 0 : index
    %230 = vector.load %arg2[%c10_103, %229, %c0_104, %c0_105] : memref<25x1x7x128xf32, #tpu.memory_space<vmem>>, vector<1x1x7x128xf32>
    %231 = vector.shape_cast %230 : vector<1x1x7x128xf32> to vector<7x128xf32>
    %232 = arith.maximumf %224, %231 : vector<7x128xf32>
    %c11 = arith.constant 11 : index
    %233 = arith.index_cast %c0_i32 : i32 to index
    %c0_106 = arith.constant 0 : index
    %c0_107 = arith.constant 0 : index
    %234 = vector.load %arg1[%c11, %233, %c0_106, %c0_107] : memref<25x1x7x128xf32, #tpu.memory_space<vmem>>, vector<1x1x7x128xf32>
    %235 = vector.shape_cast %234 : vector<1x1x7x128xf32> to vector<7x128xf32>
    %236 = arith.maximumf %228, %235 : vector<7x128xf32>
    %c11_108 = arith.constant 11 : index
    %237 = arith.index_cast %c0_i32 : i32 to index
    %c0_109 = arith.constant 0 : index
    %c0_110 = arith.constant 0 : index
    %238 = vector.load %arg2[%c11_108, %237, %c0_109, %c0_110] : memref<25x1x7x128xf32, #tpu.memory_space<vmem>>, vector<1x1x7x128xf32>
    %239 = vector.shape_cast %238 : vector<1x1x7x128xf32> to vector<7x128xf32>
    %240 = arith.maximumf %232, %239 : vector<7x128xf32>
    %c12 = arith.constant 12 : index
    %241 = arith.index_cast %c0_i32 : i32 to index
    %c0_111 = arith.constant 0 : index
    %c0_112 = arith.constant 0 : index
    %242 = vector.load %arg1[%c12, %241, %c0_111, %c0_112] : memref<25x1x7x128xf32, #tpu.memory_space<vmem>>, vector<1x1x7x128xf32>
    %243 = vector.shape_cast %242 : vector<1x1x7x128xf32> to vector<7x128xf32>
    %244 = arith.maximumf %236, %243 : vector<7x128xf32>
    %c12_113 = arith.constant 12 : index
    %245 = arith.index_cast %c0_i32 : i32 to index
    %c0_114 = arith.constant 0 : index
    %c0_115 = arith.constant 0 : index
    %246 = vector.load %arg2[%c12_113, %245, %c0_114, %c0_115] : memref<25x1x7x128xf32, #tpu.memory_space<vmem>>, vector<1x1x7x128xf32>
    %247 = vector.shape_cast %246 : vector<1x1x7x128xf32> to vector<7x128xf32>
    %248 = arith.maximumf %240, %247 : vector<7x128xf32>
    %c13 = arith.constant 13 : index
    %249 = arith.index_cast %c0_i32 : i32 to index
    %c0_116 = arith.constant 0 : index
    %c0_117 = arith.constant 0 : index
    %250 = vector.load %arg1[%c13, %249, %c0_116, %c0_117] : memref<25x1x7x128xf32, #tpu.memory_space<vmem>>, vector<1x1x7x128xf32>
    %251 = vector.shape_cast %250 : vector<1x1x7x128xf32> to vector<7x128xf32>
    %252 = arith.maximumf %244, %251 : vector<7x128xf32>
    %c13_118 = arith.constant 13 : index
    %253 = arith.index_cast %c0_i32 : i32 to index
    %c0_119 = arith.constant 0 : index
    %c0_120 = arith.constant 0 : index
    %254 = vector.load %arg2[%c13_118, %253, %c0_119, %c0_120] : memref<25x1x7x128xf32, #tpu.memory_space<vmem>>, vector<1x1x7x128xf32>
    %255 = vector.shape_cast %254 : vector<1x1x7x128xf32> to vector<7x128xf32>
    %256 = arith.maximumf %248, %255 : vector<7x128xf32>
    %c14 = arith.constant 14 : index
    %257 = arith.index_cast %c0_i32 : i32 to index
    %c0_121 = arith.constant 0 : index
    %c0_122 = arith.constant 0 : index
    %258 = vector.load %arg1[%c14, %257, %c0_121, %c0_122] : memref<25x1x7x128xf32, #tpu.memory_space<vmem>>, vector<1x1x7x128xf32>
    %259 = vector.shape_cast %258 : vector<1x1x7x128xf32> to vector<7x128xf32>
    %260 = arith.maximumf %252, %259 : vector<7x128xf32>
    %c14_123 = arith.constant 14 : index
    %261 = arith.index_cast %c0_i32 : i32 to index
    %c0_124 = arith.constant 0 : index
    %c0_125 = arith.constant 0 : index
    %262 = vector.load %arg2[%c14_123, %261, %c0_124, %c0_125] : memref<25x1x7x128xf32, #tpu.memory_space<vmem>>, vector<1x1x7x128xf32>
    %263 = vector.shape_cast %262 : vector<1x1x7x128xf32> to vector<7x128xf32>
    %264 = arith.maximumf %256, %263 : vector<7x128xf32>
    %c15 = arith.constant 15 : index
    %265 = arith.index_cast %c0_i32 : i32 to index
    %c0_126 = arith.constant 0 : index
    %c0_127 = arith.constant 0 : index
    %266 = vector.load %arg1[%c15, %265, %c0_126, %c0_127] : memref<25x1x7x128xf32, #tpu.memory_space<vmem>>, vector<1x1x7x128xf32>
    %267 = vector.shape_cast %266 : vector<1x1x7x128xf32> to vector<7x128xf32>
    %268 = arith.maximumf %260, %267 : vector<7x128xf32>
    %c15_128 = arith.constant 15 : index
    %269 = arith.index_cast %c0_i32 : i32 to index
    %c0_129 = arith.constant 0 : index
    %c0_130 = arith.constant 0 : index
    %270 = vector.load %arg2[%c15_128, %269, %c0_129, %c0_130] : memref<25x1x7x128xf32, #tpu.memory_space<vmem>>, vector<1x1x7x128xf32>
    %271 = vector.shape_cast %270 : vector<1x1x7x128xf32> to vector<7x128xf32>
    %272 = arith.maximumf %264, %271 : vector<7x128xf32>
    %c16 = arith.constant 16 : index
    %273 = arith.index_cast %c0_i32 : i32 to index
    %c0_131 = arith.constant 0 : index
    %c0_132 = arith.constant 0 : index
    %274 = vector.load %arg1[%c16, %273, %c0_131, %c0_132] : memref<25x1x7x128xf32, #tpu.memory_space<vmem>>, vector<1x1x7x128xf32>
    %275 = vector.shape_cast %274 : vector<1x1x7x128xf32> to vector<7x128xf32>
    %276 = arith.maximumf %268, %275 : vector<7x128xf32>
    %c16_133 = arith.constant 16 : index
    %277 = arith.index_cast %c0_i32 : i32 to index
    %c0_134 = arith.constant 0 : index
    %c0_135 = arith.constant 0 : index
    %278 = vector.load %arg2[%c16_133, %277, %c0_134, %c0_135] : memref<25x1x7x128xf32, #tpu.memory_space<vmem>>, vector<1x1x7x128xf32>
    %279 = vector.shape_cast %278 : vector<1x1x7x128xf32> to vector<7x128xf32>
    %280 = arith.maximumf %272, %279 : vector<7x128xf32>
    %c17 = arith.constant 17 : index
    %281 = arith.index_cast %c0_i32 : i32 to index
    %c0_136 = arith.constant 0 : index
    %c0_137 = arith.constant 0 : index
    %282 = vector.load %arg1[%c17, %281, %c0_136, %c0_137] : memref<25x1x7x128xf32, #tpu.memory_space<vmem>>, vector<1x1x7x128xf32>
    %283 = vector.shape_cast %282 : vector<1x1x7x128xf32> to vector<7x128xf32>
    %284 = arith.maximumf %276, %283 : vector<7x128xf32>
    %c17_138 = arith.constant 17 : index
    %285 = arith.index_cast %c0_i32 : i32 to index
    %c0_139 = arith.constant 0 : index
    %c0_140 = arith.constant 0 : index
    %286 = vector.load %arg2[%c17_138, %285, %c0_139, %c0_140] : memref<25x1x7x128xf32, #tpu.memory_space<vmem>>, vector<1x1x7x128xf32>
    %287 = vector.shape_cast %286 : vector<1x1x7x128xf32> to vector<7x128xf32>
    %288 = arith.maximumf %280, %287 : vector<7x128xf32>
    %c18 = arith.constant 18 : index
    %289 = arith.index_cast %c0_i32 : i32 to index
    %c0_141 = arith.constant 0 : index
    %c0_142 = arith.constant 0 : index
    %290 = vector.load %arg1[%c18, %289, %c0_141, %c0_142] : memref<25x1x7x128xf32, #tpu.memory_space<vmem>>, vector<1x1x7x128xf32>
    %291 = vector.shape_cast %290 : vector<1x1x7x128xf32> to vector<7x128xf32>
    %292 = arith.maximumf %284, %291 : vector<7x128xf32>
    %c18_143 = arith.constant 18 : index
    %293 = arith.index_cast %c0_i32 : i32 to index
    %c0_144 = arith.constant 0 : index
    %c0_145 = arith.constant 0 : index
    %294 = vector.load %arg2[%c18_143, %293, %c0_144, %c0_145] : memref<25x1x7x128xf32, #tpu.memory_space<vmem>>, vector<1x1x7x128xf32>
    %295 = vector.shape_cast %294 : vector<1x1x7x128xf32> to vector<7x128xf32>
    %296 = arith.maximumf %288, %295 : vector<7x128xf32>
    %c19 = arith.constant 19 : index
    %297 = arith.index_cast %c0_i32 : i32 to index
    %c0_146 = arith.constant 0 : index
    %c0_147 = arith.constant 0 : index
    %298 = vector.load %arg1[%c19, %297, %c0_146, %c0_147] : memref<25x1x7x128xf32, #tpu.memory_space<vmem>>, vector<1x1x7x128xf32>
    %299 = vector.shape_cast %298 : vector<1x1x7x128xf32> to vector<7x128xf32>
    %300 = arith.maximumf %292, %299 : vector<7x128xf32>
    %c19_148 = arith.constant 19 : index
    %301 = arith.index_cast %c0_i32 : i32 to index
    %c0_149 = arith.constant 0 : index
    %c0_150 = arith.constant 0 : index
    %302 = vector.load %arg2[%c19_148, %301, %c0_149, %c0_150] : memref<25x1x7x128xf32, #tpu.memory_space<vmem>>, vector<1x1x7x128xf32>
    %303 = vector.shape_cast %302 : vector<1x1x7x128xf32> to vector<7x128xf32>
    %304 = arith.maximumf %296, %303 : vector<7x128xf32>
    %c20 = arith.constant 20 : index
    %305 = arith.index_cast %c0_i32 : i32 to index
    %c0_151 = arith.constant 0 : index
    %c0_152 = arith.constant 0 : index
    %306 = vector.load %arg1[%c20, %305, %c0_151, %c0_152] : memref<25x1x7x128xf32, #tpu.memory_space<vmem>>, vector<1x1x7x128xf32>
    %307 = vector.shape_cast %306 : vector<1x1x7x128xf32> to vector<7x128xf32>
    %308 = arith.maximumf %300, %307 : vector<7x128xf32>
    %c20_153 = arith.constant 20 : index
    %309 = arith.index_cast %c0_i32 : i32 to index
    %c0_154 = arith.constant 0 : index
    %c0_155 = arith.constant 0 : index
    %310 = vector.load %arg2[%c20_153, %309, %c0_154, %c0_155] : memref<25x1x7x128xf32, #tpu.memory_space<vmem>>, vector<1x1x7x128xf32>
    %311 = vector.shape_cast %310 : vector<1x1x7x128xf32> to vector<7x128xf32>
    %312 = arith.maximumf %304, %311 : vector<7x128xf32>
    %c21 = arith.constant 21 : index
    %313 = arith.index_cast %c0_i32 : i32 to index
    %c0_156 = arith.constant 0 : index
    %c0_157 = arith.constant 0 : index
    %314 = vector.load %arg1[%c21, %313, %c0_156, %c0_157] : memref<25x1x7x128xf32, #tpu.memory_space<vmem>>, vector<1x1x7x128xf32>
    %315 = vector.shape_cast %314 : vector<1x1x7x128xf32> to vector<7x128xf32>
    %316 = arith.maximumf %308, %315 : vector<7x128xf32>
    %c21_158 = arith.constant 21 : index
    %317 = arith.index_cast %c0_i32 : i32 to index
    %c0_159 = arith.constant 0 : index
    %c0_160 = arith.constant 0 : index
    %318 = vector.load %arg2[%c21_158, %317, %c0_159, %c0_160] : memref<25x1x7x128xf32, #tpu.memory_space<vmem>>, vector<1x1x7x128xf32>
    %319 = vector.shape_cast %318 : vector<1x1x7x128xf32> to vector<7x128xf32>
    %320 = arith.maximumf %312, %319 : vector<7x128xf32>
    %c22 = arith.constant 22 : index
    %321 = arith.index_cast %c0_i32 : i32 to index
    %c0_161 = arith.constant 0 : index
    %c0_162 = arith.constant 0 : index
    %322 = vector.load %arg1[%c22, %321, %c0_161, %c0_162] : memref<25x1x7x128xf32, #tpu.memory_space<vmem>>, vector<1x1x7x128xf32>
    %323 = vector.shape_cast %322 : vector<1x1x7x128xf32> to vector<7x128xf32>
    %324 = arith.maximumf %316, %323 : vector<7x128xf32>
    %c22_163 = arith.constant 22 : index
    %325 = arith.index_cast %c0_i32 : i32 to index
    %c0_164 = arith.constant 0 : index
    %c0_165 = arith.constant 0 : index
    %326 = vector.load %arg2[%c22_163, %325, %c0_164, %c0_165] : memref<25x1x7x128xf32, #tpu.memory_space<vmem>>, vector<1x1x7x128xf32>
    %327 = vector.shape_cast %326 : vector<1x1x7x128xf32> to vector<7x128xf32>
    %328 = arith.maximumf %320, %327 : vector<7x128xf32>
    %c23 = arith.constant 23 : index
    %329 = arith.index_cast %c0_i32 : i32 to index
    %c0_166 = arith.constant 0 : index
    %c0_167 = arith.constant 0 : index
    %330 = vector.load %arg1[%c23, %329, %c0_166, %c0_167] : memref<25x1x7x128xf32, #tpu.memory_space<vmem>>, vector<1x1x7x128xf32>
    %331 = vector.shape_cast %330 : vector<1x1x7x128xf32> to vector<7x128xf32>
    %332 = arith.maximumf %324, %331 : vector<7x128xf32>
    %c23_168 = arith.constant 23 : index
    %333 = arith.index_cast %c0_i32 : i32 to index
    %c0_169 = arith.constant 0 : index
    %c0_170 = arith.constant 0 : index
    %334 = vector.load %arg2[%c23_168, %333, %c0_169, %c0_170] : memref<25x1x7x128xf32, #tpu.memory_space<vmem>>, vector<1x1x7x128xf32>
    %335 = vector.shape_cast %334 : vector<1x1x7x128xf32> to vector<7x128xf32>
    %336 = arith.maximumf %328, %335 : vector<7x128xf32>
    %c24 = arith.constant 24 : index
    %337 = arith.index_cast %c0_i32 : i32 to index
    %c0_171 = arith.constant 0 : index
    %c0_172 = arith.constant 0 : index
    %338 = vector.load %arg1[%c24, %337, %c0_171, %c0_172] : memref<25x1x7x128xf32, #tpu.memory_space<vmem>>, vector<1x1x7x128xf32>
    %339 = vector.shape_cast %338 : vector<1x1x7x128xf32> to vector<7x128xf32>
    %340 = arith.maximumf %332, %339 : vector<7x128xf32>
    %c24_173 = arith.constant 24 : index
    %341 = arith.index_cast %c0_i32 : i32 to index
    %c0_174 = arith.constant 0 : index
    %c0_175 = arith.constant 0 : index
    %342 = vector.load %arg2[%c24_173, %341, %c0_174, %c0_175] : memref<25x1x7x128xf32, #tpu.memory_space<vmem>>, vector<1x1x7x128xf32>
    %343 = vector.shape_cast %342 : vector<1x1x7x128xf32> to vector<7x128xf32>
    %344 = arith.maximumf %336, %343 : vector<7x128xf32>
    %cst_176 = arith.constant 0.000000e+00 : f32
    %345 = vector.broadcast %cst_176 : f32 to vector<7x128xf32>
    %cst_177 = arith.constant 0.000000e+00 : f32
    %346 = vector.broadcast %cst_177 : f32 to vector<7x128xf32>
    %cst_178 = arith.constant 0.000000e+00 : f32
    %347 = vector.broadcast %cst_178 : f32 to vector<7x128xf32>
    %c5_179 = arith.constant 5 : index
    %348 = arith.index_cast %c0_i32 : i32 to index
    %c0_180 = arith.constant 0 : index
    %c0_181 = arith.constant 0 : index
    %349 = vector.load %arg1[%c5_179, %348, %c0_180, %c0_181] : memref<25x1x7x128xf32, #tpu.memory_space<vmem>>, vector<1x1x7x128xf32>
    %350 = vector.shape_cast %349 : vector<1x1x7x128xf32> to vector<7x128xf32>
    %c5_182 = arith.constant 5 : index
    %351 = arith.index_cast %c0_i32 : i32 to index
    %c0_183 = arith.constant 0 : index
    %c0_184 = arith.constant 0 : index
    %352 = vector.load %arg2[%c5_182, %351, %c0_183, %c0_184] : memref<25x1x7x128xf32, #tpu.memory_space<vmem>>, vector<1x1x7x128xf32>
    %353 = vector.shape_cast %352 : vector<1x1x7x128xf32> to vector<7x128xf32>
    %354 = arith.subf %350, %340 : vector<7x128xf32>
    %355 = math.exp %354 : vector<7x128xf32>
    %356 = arith.addf %345, %355 : vector<7x128xf32>
    %357 = arith.cmpf oge, %353, %344 : vector<7x128xf32>
    %cst_185 = arith.constant 5.000000e-01 : f32
    %358 = vector.broadcast %cst_185 : f32 to vector<7x128xf32>
    %359 = arith.cmpf olt, %347, %358 : vector<7x128xf32>
    %360 = arith.andi %357, %359 : vector<7x128xi1>
    %361 = arith.select %360, %350, %346 : vector<7x128xi1>, vector<7x128xf32>
    %cst_186 = arith.constant 1.000000e+00 : f32
    %362 = vector.broadcast %cst_186 : f32 to vector<7x128xf32>
    %363 = arith.select %360, %362, %347 : vector<7x128xi1>, vector<7x128xf32>
    %c6_187 = arith.constant 6 : index
    %364 = arith.index_cast %c0_i32 : i32 to index
    %c0_188 = arith.constant 0 : index
    %c0_189 = arith.constant 0 : index
    %365 = vector.load %arg1[%c6_187, %364, %c0_188, %c0_189] : memref<25x1x7x128xf32, #tpu.memory_space<vmem>>, vector<1x1x7x128xf32>
    %366 = vector.shape_cast %365 : vector<1x1x7x128xf32> to vector<7x128xf32>
    %c6_190 = arith.constant 6 : index
    %367 = arith.index_cast %c0_i32 : i32 to index
    %c0_191 = arith.constant 0 : index
    %c0_192 = arith.constant 0 : index
    %368 = vector.load %arg2[%c6_190, %367, %c0_191, %c0_192] : memref<25x1x7x128xf32, #tpu.memory_space<vmem>>, vector<1x1x7x128xf32>
    %369 = vector.shape_cast %368 : vector<1x1x7x128xf32> to vector<7x128xf32>
    %370 = arith.subf %366, %340 : vector<7x128xf32>
    %371 = math.exp %370 : vector<7x128xf32>
    %372 = arith.addf %356, %371 : vector<7x128xf32>
    %373 = arith.cmpf oge, %369, %344 : vector<7x128xf32>
    %cst_193 = arith.constant 5.000000e-01 : f32
    %374 = vector.broadcast %cst_193 : f32 to vector<7x128xf32>
    %375 = arith.cmpf olt, %363, %374 : vector<7x128xf32>
    %376 = arith.andi %373, %375 : vector<7x128xi1>
    %377 = arith.select %376, %366, %361 : vector<7x128xi1>, vector<7x128xf32>
    %cst_194 = arith.constant 1.000000e+00 : f32
    %378 = vector.broadcast %cst_194 : f32 to vector<7x128xf32>
    %379 = arith.select %376, %378, %363 : vector<7x128xi1>, vector<7x128xf32>
    %c7_195 = arith.constant 7 : index
    %380 = arith.index_cast %c0_i32 : i32 to index
    %c0_196 = arith.constant 0 : index
    %c0_197 = arith.constant 0 : index
    %381 = vector.load %arg1[%c7_195, %380, %c0_196, %c0_197] : memref<25x1x7x128xf32, #tpu.memory_space<vmem>>, vector<1x1x7x128xf32>
    %382 = vector.shape_cast %381 : vector<1x1x7x128xf32> to vector<7x128xf32>
    %c7_198 = arith.constant 7 : index
    %383 = arith.index_cast %c0_i32 : i32 to index
    %c0_199 = arith.constant 0 : index
    %c0_200 = arith.constant 0 : index
    %384 = vector.load %arg2[%c7_198, %383, %c0_199, %c0_200] : memref<25x1x7x128xf32, #tpu.memory_space<vmem>>, vector<1x1x7x128xf32>
    %385 = vector.shape_cast %384 : vector<1x1x7x128xf32> to vector<7x128xf32>
    %386 = arith.subf %382, %340 : vector<7x128xf32>
    %387 = math.exp %386 : vector<7x128xf32>
    %388 = arith.addf %372, %387 : vector<7x128xf32>
    %389 = arith.cmpf oge, %385, %344 : vector<7x128xf32>
    %cst_201 = arith.constant 5.000000e-01 : f32
    %390 = vector.broadcast %cst_201 : f32 to vector<7x128xf32>
    %391 = arith.cmpf olt, %379, %390 : vector<7x128xf32>
    %392 = arith.andi %389, %391 : vector<7x128xi1>
    %393 = arith.select %392, %382, %377 : vector<7x128xi1>, vector<7x128xf32>
    %cst_202 = arith.constant 1.000000e+00 : f32
    %394 = vector.broadcast %cst_202 : f32 to vector<7x128xf32>
    %395 = arith.select %392, %394, %379 : vector<7x128xi1>, vector<7x128xf32>
    %c8_203 = arith.constant 8 : index
    %396 = arith.index_cast %c0_i32 : i32 to index
    %c0_204 = arith.constant 0 : index
    %c0_205 = arith.constant 0 : index
    %397 = vector.load %arg1[%c8_203, %396, %c0_204, %c0_205] : memref<25x1x7x128xf32, #tpu.memory_space<vmem>>, vector<1x1x7x128xf32>
    %398 = vector.shape_cast %397 : vector<1x1x7x128xf32> to vector<7x128xf32>
    %c8_206 = arith.constant 8 : index
    %399 = arith.index_cast %c0_i32 : i32 to index
    %c0_207 = arith.constant 0 : index
    %c0_208 = arith.constant 0 : index
    %400 = vector.load %arg2[%c8_206, %399, %c0_207, %c0_208] : memref<25x1x7x128xf32, #tpu.memory_space<vmem>>, vector<1x1x7x128xf32>
    %401 = vector.shape_cast %400 : vector<1x1x7x128xf32> to vector<7x128xf32>
    %402 = arith.subf %398, %340 : vector<7x128xf32>
    %403 = math.exp %402 : vector<7x128xf32>
    %404 = arith.addf %388, %403 : vector<7x128xf32>
    %405 = arith.cmpf oge, %401, %344 : vector<7x128xf32>
    %cst_209 = arith.constant 5.000000e-01 : f32
    %406 = vector.broadcast %cst_209 : f32 to vector<7x128xf32>
    %407 = arith.cmpf olt, %395, %406 : vector<7x128xf32>
    %408 = arith.andi %405, %407 : vector<7x128xi1>
    %409 = arith.select %408, %398, %393 : vector<7x128xi1>, vector<7x128xf32>
    %cst_210 = arith.constant 1.000000e+00 : f32
    %410 = vector.broadcast %cst_210 : f32 to vector<7x128xf32>
    %411 = arith.select %408, %410, %395 : vector<7x128xi1>, vector<7x128xf32>
    %c9_211 = arith.constant 9 : index
    %412 = arith.index_cast %c0_i32 : i32 to index
    %c0_212 = arith.constant 0 : index
    %c0_213 = arith.constant 0 : index
    %413 = vector.load %arg1[%c9_211, %412, %c0_212, %c0_213] : memref<25x1x7x128xf32, #tpu.memory_space<vmem>>, vector<1x1x7x128xf32>
    %414 = vector.shape_cast %413 : vector<1x1x7x128xf32> to vector<7x128xf32>
    %c9_214 = arith.constant 9 : index
    %415 = arith.index_cast %c0_i32 : i32 to index
    %c0_215 = arith.constant 0 : index
    %c0_216 = arith.constant 0 : index
    %416 = vector.load %arg2[%c9_214, %415, %c0_215, %c0_216] : memref<25x1x7x128xf32, #tpu.memory_space<vmem>>, vector<1x1x7x128xf32>
    %417 = vector.shape_cast %416 : vector<1x1x7x128xf32> to vector<7x128xf32>
    %418 = arith.subf %414, %340 : vector<7x128xf32>
    %419 = math.exp %418 : vector<7x128xf32>
    %420 = arith.addf %404, %419 : vector<7x128xf32>
    %421 = arith.cmpf oge, %417, %344 : vector<7x128xf32>
    %cst_217 = arith.constant 5.000000e-01 : f32
    %422 = vector.broadcast %cst_217 : f32 to vector<7x128xf32>
    %423 = arith.cmpf olt, %411, %422 : vector<7x128xf32>
    %424 = arith.andi %421, %423 : vector<7x128xi1>
    %425 = arith.select %424, %414, %409 : vector<7x128xi1>, vector<7x128xf32>
    %cst_218 = arith.constant 1.000000e+00 : f32
    %426 = vector.broadcast %cst_218 : f32 to vector<7x128xf32>
    %427 = arith.select %424, %426, %411 : vector<7x128xi1>, vector<7x128xf32>
    %c10_219 = arith.constant 10 : index
    %428 = arith.index_cast %c0_i32 : i32 to index
    %c0_220 = arith.constant 0 : index
    %c0_221 = arith.constant 0 : index
    %429 = vector.load %arg1[%c10_219, %428, %c0_220, %c0_221] : memref<25x1x7x128xf32, #tpu.memory_space<vmem>>, vector<1x1x7x128xf32>
    %430 = vector.shape_cast %429 : vector<1x1x7x128xf32> to vector<7x128xf32>
    %c10_222 = arith.constant 10 : index
    %431 = arith.index_cast %c0_i32 : i32 to index
    %c0_223 = arith.constant 0 : index
    %c0_224 = arith.constant 0 : index
    %432 = vector.load %arg2[%c10_222, %431, %c0_223, %c0_224] : memref<25x1x7x128xf32, #tpu.memory_space<vmem>>, vector<1x1x7x128xf32>
    %433 = vector.shape_cast %432 : vector<1x1x7x128xf32> to vector<7x128xf32>
    %434 = arith.subf %430, %340 : vector<7x128xf32>
    %435 = math.exp %434 : vector<7x128xf32>
    %436 = arith.addf %420, %435 : vector<7x128xf32>
    %437 = arith.cmpf oge, %433, %344 : vector<7x128xf32>
    %cst_225 = arith.constant 5.000000e-01 : f32
    %438 = vector.broadcast %cst_225 : f32 to vector<7x128xf32>
    %439 = arith.cmpf olt, %427, %438 : vector<7x128xf32>
    %440 = arith.andi %437, %439 : vector<7x128xi1>
    %441 = arith.select %440, %430, %425 : vector<7x128xi1>, vector<7x128xf32>
    %cst_226 = arith.constant 1.000000e+00 : f32
    %442 = vector.broadcast %cst_226 : f32 to vector<7x128xf32>
    %443 = arith.select %440, %442, %427 : vector<7x128xi1>, vector<7x128xf32>
    %c11_227 = arith.constant 11 : index
    %444 = arith.index_cast %c0_i32 : i32 to index
    %c0_228 = arith.constant 0 : index
    %c0_229 = arith.constant 0 : index
    %445 = vector.load %arg1[%c11_227, %444, %c0_228, %c0_229] : memref<25x1x7x128xf32, #tpu.memory_space<vmem>>, vector<1x1x7x128xf32>
    %446 = vector.shape_cast %445 : vector<1x1x7x128xf32> to vector<7x128xf32>
    %c11_230 = arith.constant 11 : index
    %447 = arith.index_cast %c0_i32 : i32 to index
    %c0_231 = arith.constant 0 : index
    %c0_232 = arith.constant 0 : index
    %448 = vector.load %arg2[%c11_230, %447, %c0_231, %c0_232] : memref<25x1x7x128xf32, #tpu.memory_space<vmem>>, vector<1x1x7x128xf32>
    %449 = vector.shape_cast %448 : vector<1x1x7x128xf32> to vector<7x128xf32>
    %450 = arith.subf %446, %340 : vector<7x128xf32>
    %451 = math.exp %450 : vector<7x128xf32>
    %452 = arith.addf %436, %451 : vector<7x128xf32>
    %453 = arith.cmpf oge, %449, %344 : vector<7x128xf32>
    %cst_233 = arith.constant 5.000000e-01 : f32
    %454 = vector.broadcast %cst_233 : f32 to vector<7x128xf32>
    %455 = arith.cmpf olt, %443, %454 : vector<7x128xf32>
    %456 = arith.andi %453, %455 : vector<7x128xi1>
    %457 = arith.select %456, %446, %441 : vector<7x128xi1>, vector<7x128xf32>
    %cst_234 = arith.constant 1.000000e+00 : f32
    %458 = vector.broadcast %cst_234 : f32 to vector<7x128xf32>
    %459 = arith.select %456, %458, %443 : vector<7x128xi1>, vector<7x128xf32>
    %c12_235 = arith.constant 12 : index
    %460 = arith.index_cast %c0_i32 : i32 to index
    %c0_236 = arith.constant 0 : index
    %c0_237 = arith.constant 0 : index
    %461 = vector.load %arg1[%c12_235, %460, %c0_236, %c0_237] : memref<25x1x7x128xf32, #tpu.memory_space<vmem>>, vector<1x1x7x128xf32>
    %462 = vector.shape_cast %461 : vector<1x1x7x128xf32> to vector<7x128xf32>
    %c12_238 = arith.constant 12 : index
    %463 = arith.index_cast %c0_i32 : i32 to index
    %c0_239 = arith.constant 0 : index
    %c0_240 = arith.constant 0 : index
    %464 = vector.load %arg2[%c12_238, %463, %c0_239, %c0_240] : memref<25x1x7x128xf32, #tpu.memory_space<vmem>>, vector<1x1x7x128xf32>
    %465 = vector.shape_cast %464 : vector<1x1x7x128xf32> to vector<7x128xf32>
    %466 = arith.subf %462, %340 : vector<7x128xf32>
    %467 = math.exp %466 : vector<7x128xf32>
    %468 = arith.addf %452, %467 : vector<7x128xf32>
    %469 = arith.cmpf oge, %465, %344 : vector<7x128xf32>
    %cst_241 = arith.constant 5.000000e-01 : f32
    %470 = vector.broadcast %cst_241 : f32 to vector<7x128xf32>
    %471 = arith.cmpf olt, %459, %470 : vector<7x128xf32>
    %472 = arith.andi %469, %471 : vector<7x128xi1>
    %473 = arith.select %472, %462, %457 : vector<7x128xi1>, vector<7x128xf32>
    %cst_242 = arith.constant 1.000000e+00 : f32
    %474 = vector.broadcast %cst_242 : f32 to vector<7x128xf32>
    %475 = arith.select %472, %474, %459 : vector<7x128xi1>, vector<7x128xf32>
    %c13_243 = arith.constant 13 : index
    %476 = arith.index_cast %c0_i32 : i32 to index
    %c0_244 = arith.constant 0 : index
    %c0_245 = arith.constant 0 : index
    %477 = vector.load %arg1[%c13_243, %476, %c0_244, %c0_245] : memref<25x1x7x128xf32, #tpu.memory_space<vmem>>, vector<1x1x7x128xf32>
    %478 = vector.shape_cast %477 : vector<1x1x7x128xf32> to vector<7x128xf32>
    %c13_246 = arith.constant 13 : index
    %479 = arith.index_cast %c0_i32 : i32 to index
    %c0_247 = arith.constant 0 : index
    %c0_248 = arith.constant 0 : index
    %480 = vector.load %arg2[%c13_246, %479, %c0_247, %c0_248] : memref<25x1x7x128xf32, #tpu.memory_space<vmem>>, vector<1x1x7x128xf32>
    %481 = vector.shape_cast %480 : vector<1x1x7x128xf32> to vector<7x128xf32>
    %482 = arith.subf %478, %340 : vector<7x128xf32>
    %483 = math.exp %482 : vector<7x128xf32>
    %484 = arith.addf %468, %483 : vector<7x128xf32>
    %485 = arith.cmpf oge, %481, %344 : vector<7x128xf32>
    %cst_249 = arith.constant 5.000000e-01 : f32
    %486 = vector.broadcast %cst_249 : f32 to vector<7x128xf32>
    %487 = arith.cmpf olt, %475, %486 : vector<7x128xf32>
    %488 = arith.andi %485, %487 : vector<7x128xi1>
    %489 = arith.select %488, %478, %473 : vector<7x128xi1>, vector<7x128xf32>
    %cst_250 = arith.constant 1.000000e+00 : f32
    %490 = vector.broadcast %cst_250 : f32 to vector<7x128xf32>
    %491 = arith.select %488, %490, %475 : vector<7x128xi1>, vector<7x128xf32>
    %c14_251 = arith.constant 14 : index
    %492 = arith.index_cast %c0_i32 : i32 to index
    %c0_252 = arith.constant 0 : index
    %c0_253 = arith.constant 0 : index
    %493 = vector.load %arg1[%c14_251, %492, %c0_252, %c0_253] : memref<25x1x7x128xf32, #tpu.memory_space<vmem>>, vector<1x1x7x128xf32>
    %494 = vector.shape_cast %493 : vector<1x1x7x128xf32> to vector<7x128xf32>
    %c14_254 = arith.constant 14 : index
    %495 = arith.index_cast %c0_i32 : i32 to index
    %c0_255 = arith.constant 0 : index
    %c0_256 = arith.constant 0 : index
    %496 = vector.load %arg2[%c14_254, %495, %c0_255, %c0_256] : memref<25x1x7x128xf32, #tpu.memory_space<vmem>>, vector<1x1x7x128xf32>
    %497 = vector.shape_cast %496 : vector<1x1x7x128xf32> to vector<7x128xf32>
    %498 = arith.subf %494, %340 : vector<7x128xf32>
    %499 = math.exp %498 : vector<7x128xf32>
    %500 = arith.addf %484, %499 : vector<7x128xf32>
    %501 = arith.cmpf oge, %497, %344 : vector<7x128xf32>
    %cst_257 = arith.constant 5.000000e-01 : f32
    %502 = vector.broadcast %cst_257 : f32 to vector<7x128xf32>
    %503 = arith.cmpf olt, %491, %502 : vector<7x128xf32>
    %504 = arith.andi %501, %503 : vector<7x128xi1>
    %505 = arith.select %504, %494, %489 : vector<7x128xi1>, vector<7x128xf32>
    %cst_258 = arith.constant 1.000000e+00 : f32
    %506 = vector.broadcast %cst_258 : f32 to vector<7x128xf32>
    %507 = arith.select %504, %506, %491 : vector<7x128xi1>, vector<7x128xf32>
    %c15_259 = arith.constant 15 : index
    %508 = arith.index_cast %c0_i32 : i32 to index
    %c0_260 = arith.constant 0 : index
    %c0_261 = arith.constant 0 : index
    %509 = vector.load %arg1[%c15_259, %508, %c0_260, %c0_261] : memref<25x1x7x128xf32, #tpu.memory_space<vmem>>, vector<1x1x7x128xf32>
    %510 = vector.shape_cast %509 : vector<1x1x7x128xf32> to vector<7x128xf32>
    %c15_262 = arith.constant 15 : index
    %511 = arith.index_cast %c0_i32 : i32 to index
    %c0_263 = arith.constant 0 : index
    %c0_264 = arith.constant 0 : index
    %512 = vector.load %arg2[%c15_262, %511, %c0_263, %c0_264] : memref<25x1x7x128xf32, #tpu.memory_space<vmem>>, vector<1x1x7x128xf32>
    %513 = vector.shape_cast %512 : vector<1x1x7x128xf32> to vector<7x128xf32>
    %514 = arith.subf %510, %340 : vector<7x128xf32>
    %515 = math.exp %514 : vector<7x128xf32>
    %516 = arith.addf %500, %515 : vector<7x128xf32>
    %517 = arith.cmpf oge, %513, %344 : vector<7x128xf32>
    %cst_265 = arith.constant 5.000000e-01 : f32
    %518 = vector.broadcast %cst_265 : f32 to vector<7x128xf32>
    %519 = arith.cmpf olt, %507, %518 : vector<7x128xf32>
    %520 = arith.andi %517, %519 : vector<7x128xi1>
    %521 = arith.select %520, %510, %505 : vector<7x128xi1>, vector<7x128xf32>
    %cst_266 = arith.constant 1.000000e+00 : f32
    %522 = vector.broadcast %cst_266 : f32 to vector<7x128xf32>
    %523 = arith.select %520, %522, %507 : vector<7x128xi1>, vector<7x128xf32>
    %c16_267 = arith.constant 16 : index
    %524 = arith.index_cast %c0_i32 : i32 to index
    %c0_268 = arith.constant 0 : index
    %c0_269 = arith.constant 0 : index
    %525 = vector.load %arg1[%c16_267, %524, %c0_268, %c0_269] : memref<25x1x7x128xf32, #tpu.memory_space<vmem>>, vector<1x1x7x128xf32>
    %526 = vector.shape_cast %525 : vector<1x1x7x128xf32> to vector<7x128xf32>
    %c16_270 = arith.constant 16 : index
    %527 = arith.index_cast %c0_i32 : i32 to index
    %c0_271 = arith.constant 0 : index
    %c0_272 = arith.constant 0 : index
    %528 = vector.load %arg2[%c16_270, %527, %c0_271, %c0_272] : memref<25x1x7x128xf32, #tpu.memory_space<vmem>>, vector<1x1x7x128xf32>
    %529 = vector.shape_cast %528 : vector<1x1x7x128xf32> to vector<7x128xf32>
    %530 = arith.subf %526, %340 : vector<7x128xf32>
    %531 = math.exp %530 : vector<7x128xf32>
    %532 = arith.addf %516, %531 : vector<7x128xf32>
    %533 = arith.cmpf oge, %529, %344 : vector<7x128xf32>
    %cst_273 = arith.constant 5.000000e-01 : f32
    %534 = vector.broadcast %cst_273 : f32 to vector<7x128xf32>
    %535 = arith.cmpf olt, %523, %534 : vector<7x128xf32>
    %536 = arith.andi %533, %535 : vector<7x128xi1>
    %537 = arith.select %536, %526, %521 : vector<7x128xi1>, vector<7x128xf32>
    %cst_274 = arith.constant 1.000000e+00 : f32
    %538 = vector.broadcast %cst_274 : f32 to vector<7x128xf32>
    %539 = arith.select %536, %538, %523 : vector<7x128xi1>, vector<7x128xf32>
    %c17_275 = arith.constant 17 : index
    %540 = arith.index_cast %c0_i32 : i32 to index
    %c0_276 = arith.constant 0 : index
    %c0_277 = arith.constant 0 : index
    %541 = vector.load %arg1[%c17_275, %540, %c0_276, %c0_277] : memref<25x1x7x128xf32, #tpu.memory_space<vmem>>, vector<1x1x7x128xf32>
    %542 = vector.shape_cast %541 : vector<1x1x7x128xf32> to vector<7x128xf32>
    %c17_278 = arith.constant 17 : index
    %543 = arith.index_cast %c0_i32 : i32 to index
    %c0_279 = arith.constant 0 : index
    %c0_280 = arith.constant 0 : index
    %544 = vector.load %arg2[%c17_278, %543, %c0_279, %c0_280] : memref<25x1x7x128xf32, #tpu.memory_space<vmem>>, vector<1x1x7x128xf32>
    %545 = vector.shape_cast %544 : vector<1x1x7x128xf32> to vector<7x128xf32>
    %546 = arith.subf %542, %340 : vector<7x128xf32>
    %547 = math.exp %546 : vector<7x128xf32>
    %548 = arith.addf %532, %547 : vector<7x128xf32>
    %549 = arith.cmpf oge, %545, %344 : vector<7x128xf32>
    %cst_281 = arith.constant 5.000000e-01 : f32
    %550 = vector.broadcast %cst_281 : f32 to vector<7x128xf32>
    %551 = arith.cmpf olt, %539, %550 : vector<7x128xf32>
    %552 = arith.andi %549, %551 : vector<7x128xi1>
    %553 = arith.select %552, %542, %537 : vector<7x128xi1>, vector<7x128xf32>
    %cst_282 = arith.constant 1.000000e+00 : f32
    %554 = vector.broadcast %cst_282 : f32 to vector<7x128xf32>
    %555 = arith.select %552, %554, %539 : vector<7x128xi1>, vector<7x128xf32>
    %c18_283 = arith.constant 18 : index
    %556 = arith.index_cast %c0_i32 : i32 to index
    %c0_284 = arith.constant 0 : index
    %c0_285 = arith.constant 0 : index
    %557 = vector.load %arg1[%c18_283, %556, %c0_284, %c0_285] : memref<25x1x7x128xf32, #tpu.memory_space<vmem>>, vector<1x1x7x128xf32>
    %558 = vector.shape_cast %557 : vector<1x1x7x128xf32> to vector<7x128xf32>
    %c18_286 = arith.constant 18 : index
    %559 = arith.index_cast %c0_i32 : i32 to index
    %c0_287 = arith.constant 0 : index
    %c0_288 = arith.constant 0 : index
    %560 = vector.load %arg2[%c18_286, %559, %c0_287, %c0_288] : memref<25x1x7x128xf32, #tpu.memory_space<vmem>>, vector<1x1x7x128xf32>
    %561 = vector.shape_cast %560 : vector<1x1x7x128xf32> to vector<7x128xf32>
    %562 = arith.subf %558, %340 : vector<7x128xf32>
    %563 = math.exp %562 : vector<7x128xf32>
    %564 = arith.addf %548, %563 : vector<7x128xf32>
    %565 = arith.cmpf oge, %561, %344 : vector<7x128xf32>
    %cst_289 = arith.constant 5.000000e-01 : f32
    %566 = vector.broadcast %cst_289 : f32 to vector<7x128xf32>
    %567 = arith.cmpf olt, %555, %566 : vector<7x128xf32>
    %568 = arith.andi %565, %567 : vector<7x128xi1>
    %569 = arith.select %568, %558, %553 : vector<7x128xi1>, vector<7x128xf32>
    %cst_290 = arith.constant 1.000000e+00 : f32
    %570 = vector.broadcast %cst_290 : f32 to vector<7x128xf32>
    %571 = arith.select %568, %570, %555 : vector<7x128xi1>, vector<7x128xf32>
    %c19_291 = arith.constant 19 : index
    %572 = arith.index_cast %c0_i32 : i32 to index
    %c0_292 = arith.constant 0 : index
    %c0_293 = arith.constant 0 : index
    %573 = vector.load %arg1[%c19_291, %572, %c0_292, %c0_293] : memref<25x1x7x128xf32, #tpu.memory_space<vmem>>, vector<1x1x7x128xf32>
    %574 = vector.shape_cast %573 : vector<1x1x7x128xf32> to vector<7x128xf32>
    %c19_294 = arith.constant 19 : index
    %575 = arith.index_cast %c0_i32 : i32 to index
    %c0_295 = arith.constant 0 : index
    %c0_296 = arith.constant 0 : index
    %576 = vector.load %arg2[%c19_294, %575, %c0_295, %c0_296] : memref<25x1x7x128xf32, #tpu.memory_space<vmem>>, vector<1x1x7x128xf32>
    %577 = vector.shape_cast %576 : vector<1x1x7x128xf32> to vector<7x128xf32>
    %578 = arith.subf %574, %340 : vector<7x128xf32>
    %579 = math.exp %578 : vector<7x128xf32>
    %580 = arith.addf %564, %579 : vector<7x128xf32>
    %581 = arith.cmpf oge, %577, %344 : vector<7x128xf32>
    %cst_297 = arith.constant 5.000000e-01 : f32
    %582 = vector.broadcast %cst_297 : f32 to vector<7x128xf32>
    %583 = arith.cmpf olt, %571, %582 : vector<7x128xf32>
    %584 = arith.andi %581, %583 : vector<7x128xi1>
    %585 = arith.select %584, %574, %569 : vector<7x128xi1>, vector<7x128xf32>
    %cst_298 = arith.constant 1.000000e+00 : f32
    %586 = vector.broadcast %cst_298 : f32 to vector<7x128xf32>
    %587 = arith.select %584, %586, %571 : vector<7x128xi1>, vector<7x128xf32>
    %c20_299 = arith.constant 20 : index
    %588 = arith.index_cast %c0_i32 : i32 to index
    %c0_300 = arith.constant 0 : index
    %c0_301 = arith.constant 0 : index
    %589 = vector.load %arg1[%c20_299, %588, %c0_300, %c0_301] : memref<25x1x7x128xf32, #tpu.memory_space<vmem>>, vector<1x1x7x128xf32>
    %590 = vector.shape_cast %589 : vector<1x1x7x128xf32> to vector<7x128xf32>
    %c20_302 = arith.constant 20 : index
    %591 = arith.index_cast %c0_i32 : i32 to index
    %c0_303 = arith.constant 0 : index
    %c0_304 = arith.constant 0 : index
    %592 = vector.load %arg2[%c20_302, %591, %c0_303, %c0_304] : memref<25x1x7x128xf32, #tpu.memory_space<vmem>>, vector<1x1x7x128xf32>
    %593 = vector.shape_cast %592 : vector<1x1x7x128xf32> to vector<7x128xf32>
    %594 = arith.subf %590, %340 : vector<7x128xf32>
    %595 = math.exp %594 : vector<7x128xf32>
    %596 = arith.addf %580, %595 : vector<7x128xf32>
    %597 = arith.cmpf oge, %593, %344 : vector<7x128xf32>
    %cst_305 = arith.constant 5.000000e-01 : f32
    %598 = vector.broadcast %cst_305 : f32 to vector<7x128xf32>
    %599 = arith.cmpf olt, %587, %598 : vector<7x128xf32>
    %600 = arith.andi %597, %599 : vector<7x128xi1>
    %601 = arith.select %600, %590, %585 : vector<7x128xi1>, vector<7x128xf32>
    %cst_306 = arith.constant 1.000000e+00 : f32
    %602 = vector.broadcast %cst_306 : f32 to vector<7x128xf32>
    %603 = arith.select %600, %602, %587 : vector<7x128xi1>, vector<7x128xf32>
    %c21_307 = arith.constant 21 : index
    %604 = arith.index_cast %c0_i32 : i32 to index
    %c0_308 = arith.constant 0 : index
    %c0_309 = arith.constant 0 : index
    %605 = vector.load %arg1[%c21_307, %604, %c0_308, %c0_309] : memref<25x1x7x128xf32, #tpu.memory_space<vmem>>, vector<1x1x7x128xf32>
    %606 = vector.shape_cast %605 : vector<1x1x7x128xf32> to vector<7x128xf32>
    %c21_310 = arith.constant 21 : index
    %607 = arith.index_cast %c0_i32 : i32 to index
    %c0_311 = arith.constant 0 : index
    %c0_312 = arith.constant 0 : index
    %608 = vector.load %arg2[%c21_310, %607, %c0_311, %c0_312] : memref<25x1x7x128xf32, #tpu.memory_space<vmem>>, vector<1x1x7x128xf32>
    %609 = vector.shape_cast %608 : vector<1x1x7x128xf32> to vector<7x128xf32>
    %610 = arith.subf %606, %340 : vector<7x128xf32>
    %611 = math.exp %610 : vector<7x128xf32>
    %612 = arith.addf %596, %611 : vector<7x128xf32>
    %613 = arith.cmpf oge, %609, %344 : vector<7x128xf32>
    %cst_313 = arith.constant 5.000000e-01 : f32
    %614 = vector.broadcast %cst_313 : f32 to vector<7x128xf32>
    %615 = arith.cmpf olt, %603, %614 : vector<7x128xf32>
    %616 = arith.andi %613, %615 : vector<7x128xi1>
    %617 = arith.select %616, %606, %601 : vector<7x128xi1>, vector<7x128xf32>
    %cst_314 = arith.constant 1.000000e+00 : f32
    %618 = vector.broadcast %cst_314 : f32 to vector<7x128xf32>
    %619 = arith.select %616, %618, %603 : vector<7x128xi1>, vector<7x128xf32>
    %c22_315 = arith.constant 22 : index
    %620 = arith.index_cast %c0_i32 : i32 to index
    %c0_316 = arith.constant 0 : index
    %c0_317 = arith.constant 0 : index
    %621 = vector.load %arg1[%c22_315, %620, %c0_316, %c0_317] : memref<25x1x7x128xf32, #tpu.memory_space<vmem>>, vector<1x1x7x128xf32>
    %622 = vector.shape_cast %621 : vector<1x1x7x128xf32> to vector<7x128xf32>
    %c22_318 = arith.constant 22 : index
    %623 = arith.index_cast %c0_i32 : i32 to index
    %c0_319 = arith.constant 0 : index
    %c0_320 = arith.constant 0 : index
    %624 = vector.load %arg2[%c22_318, %623, %c0_319, %c0_320] : memref<25x1x7x128xf32, #tpu.memory_space<vmem>>, vector<1x1x7x128xf32>
    %625 = vector.shape_cast %624 : vector<1x1x7x128xf32> to vector<7x128xf32>
    %626 = arith.subf %622, %340 : vector<7x128xf32>
    %627 = math.exp %626 : vector<7x128xf32>
    %628 = arith.addf %612, %627 : vector<7x128xf32>
    %629 = arith.cmpf oge, %625, %344 : vector<7x128xf32>
    %cst_321 = arith.constant 5.000000e-01 : f32
    %630 = vector.broadcast %cst_321 : f32 to vector<7x128xf32>
    %631 = arith.cmpf olt, %619, %630 : vector<7x128xf32>
    %632 = arith.andi %629, %631 : vector<7x128xi1>
    %633 = arith.select %632, %622, %617 : vector<7x128xi1>, vector<7x128xf32>
    %cst_322 = arith.constant 1.000000e+00 : f32
    %634 = vector.broadcast %cst_322 : f32 to vector<7x128xf32>
    %635 = arith.select %632, %634, %619 : vector<7x128xi1>, vector<7x128xf32>
    %c23_323 = arith.constant 23 : index
    %636 = arith.index_cast %c0_i32 : i32 to index
    %c0_324 = arith.constant 0 : index
    %c0_325 = arith.constant 0 : index
    %637 = vector.load %arg1[%c23_323, %636, %c0_324, %c0_325] : memref<25x1x7x128xf32, #tpu.memory_space<vmem>>, vector<1x1x7x128xf32>
    %638 = vector.shape_cast %637 : vector<1x1x7x128xf32> to vector<7x128xf32>
    %c23_326 = arith.constant 23 : index
    %639 = arith.index_cast %c0_i32 : i32 to index
    %c0_327 = arith.constant 0 : index
    %c0_328 = arith.constant 0 : index
    %640 = vector.load %arg2[%c23_326, %639, %c0_327, %c0_328] : memref<25x1x7x128xf32, #tpu.memory_space<vmem>>, vector<1x1x7x128xf32>
    %641 = vector.shape_cast %640 : vector<1x1x7x128xf32> to vector<7x128xf32>
    %642 = arith.subf %638, %340 : vector<7x128xf32>
    %643 = math.exp %642 : vector<7x128xf32>
    %644 = arith.addf %628, %643 : vector<7x128xf32>
    %645 = arith.cmpf oge, %641, %344 : vector<7x128xf32>
    %cst_329 = arith.constant 5.000000e-01 : f32
    %646 = vector.broadcast %cst_329 : f32 to vector<7x128xf32>
    %647 = arith.cmpf olt, %635, %646 : vector<7x128xf32>
    %648 = arith.andi %645, %647 : vector<7x128xi1>
    %649 = arith.select %648, %638, %633 : vector<7x128xi1>, vector<7x128xf32>
    %cst_330 = arith.constant 1.000000e+00 : f32
    %650 = vector.broadcast %cst_330 : f32 to vector<7x128xf32>
    %651 = arith.select %648, %650, %635 : vector<7x128xi1>, vector<7x128xf32>
    %c24_331 = arith.constant 24 : index
    %652 = arith.index_cast %c0_i32 : i32 to index
    %c0_332 = arith.constant 0 : index
    %c0_333 = arith.constant 0 : index
    %653 = vector.load %arg1[%c24_331, %652, %c0_332, %c0_333] : memref<25x1x7x128xf32, #tpu.memory_space<vmem>>, vector<1x1x7x128xf32>
    %654 = vector.shape_cast %653 : vector<1x1x7x128xf32> to vector<7x128xf32>
    %c24_334 = arith.constant 24 : index
    %655 = arith.index_cast %c0_i32 : i32 to index
    %c0_335 = arith.constant 0 : index
    %c0_336 = arith.constant 0 : index
    %656 = vector.load %arg2[%c24_334, %655, %c0_335, %c0_336] : memref<25x1x7x128xf32, #tpu.memory_space<vmem>>, vector<1x1x7x128xf32>
    %657 = vector.shape_cast %656 : vector<1x1x7x128xf32> to vector<7x128xf32>
    %658 = arith.subf %654, %340 : vector<7x128xf32>
    %659 = math.exp %658 : vector<7x128xf32>
    %660 = arith.addf %644, %659 : vector<7x128xf32>
    %661 = arith.cmpf oge, %657, %344 : vector<7x128xf32>
    %cst_337 = arith.constant 5.000000e-01 : f32
    %662 = vector.broadcast %cst_337 : f32 to vector<7x128xf32>
    %663 = arith.cmpf olt, %651, %662 : vector<7x128xf32>
    %664 = arith.andi %661, %663 : vector<7x128xi1>
    %665 = arith.select %664, %654, %649 : vector<7x128xi1>, vector<7x128xf32>
    %666 = math.log %660 : vector<7x128xf32>
    %667 = arith.addf %340, %666 : vector<7x128xf32>
    %668 = arith.subf %667, %665 : vector<7x128xf32>
    %669 = arith.mulf %40, %668 : vector<7x128xf32>
    %cst_338 = arith.constant 5.000000e+00 : f32
    %670 = vector.broadcast %cst_338 : f32 to vector<7x128xf32>
    %671 = arith.mulf %670, %126 : vector<7x128xf32>
    %cst_339 = arith.constant 5.000000e+00 : f32
    %672 = vector.broadcast %cst_339 : f32 to vector<7x128xf32>
    %673 = arith.mulf %672, %147 : vector<7x128xf32>
    %674 = arith.addf %671, %673 : vector<7x128xf32>
    %675 = arith.addf %674, %159 : vector<7x128xf32>
    %676 = arith.addf %675, %186 : vector<7x128xf32>
    %cst_340 = arith.constant 5.917160e-04 : f32
    %677 = vector.broadcast %cst_340 : f32 to vector<7x128xf32>
    %678 = arith.mulf %669, %677 : vector<7x128xf32>
    %679 = arith.addf %676, %678 : vector<7x128xf32>
    %680 = arith.addf %10, %679 : vector<7x128xf32>
    %c1_i32_341 = arith.constant 1 : i32
    %cst_342 = arith.constant 0.000000e+00 : f32
    %681 = vector.broadcast %cst_342 : f32 to vector<1x8x128xf32>
    %682 = vector.shape_cast %680 : vector<7x128xf32> to vector<1x7x128xf32>
    %cst_343 = arith.constant dense<0.000000e+00> : vector<1xf32>
    %683 = vector.multi_reduction <add>, %682, %cst_343 [1, 2] : vector<1x7x128xf32> to vector<1xf32>
    %684 = vector.shape_cast %683 : vector<1xf32> to vector<1x1x1xf32>
    %685 = vector.extract %684[0, 0, 0] : f32 from vector<1x1x1xf32>
    %686 = vector.broadcast %685 : f32 to vector<1x8x128xf32>
    %687 = arith.addf %681, %686 : vector<1x8x128xf32>
    %c0_344 = arith.constant 0 : index
    %c0_345 = arith.constant 0 : index
    %c0_346 = arith.constant 0 : index
    %688 = vector.load %arg4[%c0_344, %c0_345, %c0_346] : memref<1x8x128xf32, #tpu.memory_space<vmem>>, vector<1x8x128xf32>
    tpu.vector_store %arg4[%c0_344, %c0_345, %c0_346], %687 {strides = array<i32>} : memref<1x8x128xf32, #tpu.memory_space<vmem>>, vector<1x8x128xf32>,
    return
  }
  func.func @transform_0(%arg0: i32) -> (i32, i32, i32, i32) {
    %c0_i32 = arith.constant 0 : i32
    %c0_i32_0 = arith.constant 0 : i32
    %c0_i32_1 = arith.constant 0 : i32
    %c0_i32_2 = arith.constant 0 : i32
    return %c0_i32, %arg0, %c0_i32_0, %c0_i32_1 : i32, i32, i32, i32
  }
  func.func @transform_1(%arg0: i32) -> (i32, i32, i32, i32) {
    %c0_i32 = arith.constant 0 : i32
    %c0_i32_0 = arith.constant 0 : i32
    %c0_i32_1 = arith.constant 0 : i32
    %c0_i32_2 = arith.constant 0 : i32
    return %c0_i32, %arg0, %c0_i32_0, %c0_i32_1 : i32, i32, i32, i32
  }
  func.func @transform_2(%arg0: i32) -> (i32, i32, i32) {
    %c0_i32 = arith.constant 0 : i32
    %c0_i32_0 = arith.constant 0 : i32
    %c0_i32_1 = arith.constant 0 : i32
    %c0_i32_2 = arith.constant 0 : i32
    return %c0_i32, %c0_i32_0, %c0_i32_1 : i32, i32, i32
  }
  func.func @transform_3(%arg0: i32) -> (i32, i32, i32) {
    %c0_i32 = arith.constant 0 : i32
    %c0_i32_0 = arith.constant 0 : i32
    %c0_i32_1 = arith.constant 0 : i32
    return %arg0, %c0_i32, %c0_i32_0 : i32, i32, i32
  }
}

</mosaic_0001>

<bundles_post_ra>
// kernel: yolo_v2_loss.1
= control target key start
LH: loop header
LB: loop body
LE: loop exit
PB: predicated region body
PF: predicated region fallthrough
CT: control target
= control target key end

     0   :  { %s1213_s12 = smov 0   ;;  %s1215_s13 = smov 0   ;;  %s1911_s0 = inlined_call_operand.vmem [shape: f32[25,2,7,128], index: 0, kind: input, shape index: {}]   ;;  %s1912_s1 = inlined_call_operand.vmem [shape: f32[25,2,7,128], index: 1, kind: input, shape index: {}]   ;;  %s1913_s2 = inlined_call_operand.vmem [shape: f32[5,7,128], index: 2, kind: input, shape index: {}]   ;;  %s1914_s3 = inlined_call_operand.vmem [shape: f32[2,8,128], index: 3, kind: output, shape index: {}]  }
   0x1   :  { %s1217_s14 = smov 0  }
   0x2 LB: > { %s1229_s15 = sadd.s32 4294967295, %s1190_s14   ;;  %s1232_s16 = sadd.s32 1, %s1190_s14   ;;  %s1190_s14 = sphi %s1217_s14, %s1962_s14   ;;  %s1186_s13 = sphi %s1215_s13, %s1961_s13   ;;  %s1182_s12 = sphi %s1213_s12, %s1960_s12  }
   0x3   : > { %s17_s17 = ssub.s32 %s1190_s14, %s1232_s16  ;;  %s20_s18 = sadd.s32 1, %s1186_s13 }
   0x4   : > { %p18_p0 = scmp.eq.s32.totalorder %s17_s17, 0  ;;  %p27_p1 = scmp.ne.s32.totalorder %s1186_s13, %s1182_s12 }
   0x5   : > { %p28_p2 = scmp.eq.s32.totalorder %s1190_s14, 0  ;;  %p1014_p4 = scmp.ge.s32.totalorder %s1190_s14, 2 }
   0x6   : > { %s1241_s19 = scalar_select %p18_p0, %s1186_s13, %s20_s18  }
   0x7   : > { %p1243_p3 = por %p28_p2, %p27_p1  ;;  %129 = sbr.rel (%p1014_p4) target bundleno = 46 (0x2e), region = 20 }
   0xc   : > { %132 = sbr.rel (!%p1243_p3) target bundleno = 29 (0x1d), region = 24  ;;  %s134_s21 = sand.u32 (%p1243_p3), 1, %s1186_s13  }
   0xd   : > { %s1015_s22 = sshll.u32 (%p1243_p3), %s1190_s14, 3  ;;  %s1074_s23 = smul.u32 (%p1243_p3), 200, %s134_s21 }
   0xe   : > { %s1255_s26 = scalar_lea.vmem (%p1243_p3), %s1911_s0, %s1015_s22 }
   0xf   : > { %v215_v0 = vld [vmem:[%s1255_s26] sm:$0xff] (%p1243_p3)  ;;  %v217_v1 = vld [vmem:[%s1255_s26 + $0x10] sm:$0xff] (%p1243_p3)  ;;  %s1263_s27 = scalar_lea.vmem (%p1243_p3), [#allocation2], %s1074_s23 }
  0x10   : > { %v219_v2 = vld [vmem:[%s1255_s26 + $0x20] sm:$0xff] (%p1243_p3)  ;;  %v221_v3 = vld [vmem:[%s1255_s26 + $0x30] sm:$0xff] (%p1243_p3)  ;;  %216 = vst [vmem:[%s1263_s27] sm:$0xff] (%p1243_p3), %v215_v0  ;;  %218 = vst [vmem:[%s1263_s27 + $0x8] sm:$0xff] (%p1243_p3), %v217_v1 }
  0x11   : > { %v223_v4 = vld [vmem:[%s1255_s26 + $0x40] sm:$0xff]  ;;  %v225_v5 = vld [vmem:[%s1255_s26 + $0x50] sm:$0xff]  ;;  %220 = vst [vmem:[%s1263_s27 + $0x10] sm:$0xff] %v219_v2  ;;  %222 = vst [vmem:[%s1263_s27 + $0x18] sm:$0xff] %v221_v3 }
  0x12   : > { %224 = vst [vmem:[%s1263_s27 + $0x20] sm:$0xff] %v223_v4  ;;  %226 = vst [vmem:[%s1263_s27 + $0x28] sm:$0xff] %v225_v5  ;;  %v227_v6 = vld [vmem:[%s1255_s26 + $0x60] sm:$0xff]  ;;  %v229_v7 = vld [vmem:[%s1255_s26 + $0x70] sm:$0xff] }
  0x13   : > { %v231_v8 = vld [vmem:[%s1255_s26 + $0x80] sm:$0xff]  ;;  %228 = vst [vmem:[%s1263_s27 + $0x30] sm:$0xff] %v227_v6  ;;  %230 = vst [vmem:[%s1263_s27 + $0x38] sm:$0xff] %v229_v7  ;;  %v233_v9 = vld [vmem:[%s1255_s26 + $0x90] sm:$0xff] }
  0x14   : > { %232 = vst [vmem:[%s1263_s27 + $0x40] sm:$0xff] %v231_v8  ;;  %v235_v10 = vld [vmem:[%s1255_s26 + $0xa0] sm:$0xff]  ;;  %v237_v11 = vld [vmem:[%s1255_s26 + $0xb0] sm:$0xff]  ;;  %234 = vst [vmem:[%s1263_s27 + $0x48] sm:$0xff] %v233_v9 }
  0x15   : > { %236 = vst [vmem:[%s1263_s27 + $0x50] sm:$0xff] %v235_v10  ;;  %238 = vst [vmem:[%s1263_s27 + $0x58] sm:$0xff] %v237_v11  ;;  %v239_v12 = vld [vmem:[%s1255_s26 + $0xc0] sm:$0xff]  ;;  %v241_v13 = vld [vmem:[%s1255_s26 + $0xd0] sm:$0xff] }
  0x16   : > { %v243_v14 = vld [vmem:[%s1255_s26 + $0xe0] sm:$0xff]  ;;  %240 = vst [vmem:[%s1263_s27 + $0x60] sm:$0xff] %v239_v12  ;;  %242 = vst [vmem:[%s1263_s27 + $0x68] sm:$0xff] %v241_v13  ;;  %v245_v15 = vld [vmem:[%s1255_s26 + $0xf0] sm:$0xff] }
  0x17   : > { %244 = vst [vmem:[%s1263_s27 + $0x70] sm:$0xff] %v243_v14  ;;  %v247_v16 = vld [vmem:[%s1255_s26 + $0x100] sm:$0xff]  ;;  %v249_v17 = vld [vmem:[%s1255_s26 + $0x110] sm:$0xff]  ;;  %246 = vst [vmem:[%s1263_s27 + $0x78] sm:$0xff] %v245_v15 }
  0x18   : > { %248 = vst [vmem:[%s1263_s27 + $0x80] sm:$0xff] %v247_v16  ;;  %250 = vst [vmem:[%s1263_s27 + $0x88] sm:$0xff] %v249_v17  ;;  %v251_v18 = vld [vmem:[%s1255_s26 + $0x120] sm:$0xff]  ;;  %v253_v19 = vld [vmem:[%s1255_s26 + $0x130] sm:$0xff] }
  0x19   : > { %v255_v20 = vld [vmem:[%s1255_s26 + $0x140] sm:$0xff]  ;;  %252 = vst [vmem:[%s1263_s27 + $0x90] sm:$0xff] %v251_v18  ;;  %254 = vst [vmem:[%s1263_s27 + $0x98] sm:$0xff] %v253_v19  ;;  %v257_v21 = vld [vmem:[%s1255_s26 + $0x150] sm:$0xff] }
  0x1a   : > { %256 = vst [vmem:[%s1263_s27 + $0xa0] sm:$0xff] %v255_v20  ;;  %v259_v22 = vld [vmem:[%s1255_s26 + $0x160] sm:$0xff]  ;;  %v261_v23 = vld [vmem:[%s1255_s26 + $0x170] sm:$0xff]  ;;  %258 = vst [vmem:[%s1263_s27 + $0xa8] sm:$0xff] %v257_v21 }
  0x1b   : > { %260 = vst [vmem:[%s1263_s27 + $0xb0] sm:$0xff] %v259_v22  ;;  %262 = vst [vmem:[%s1263_s27 + $0xb8] sm:$0xff] %v261_v23  ;;  %v263_v24 = vld [vmem:[%s1255_s26 + $0x180] sm:$0xff] }
  0x1c   : > { %264 = vst [vmem:[%s1263_s27 + $0xc0] sm:$0xff] %v263_v24 }
  0x1d PF: > { %270 = sbr.rel (!%p1243_p3) target bundleno = 46 (0x2e), region = 62  ;;  %s272_s28 = sand.u32 (%p1243_p3), 1, %s1186_s13  }
  0x1e   : > { %s1016_s29 = sshll.u32 (%p1243_p3), %s1190_s14, 3  ;;  %s1075_s30 = smul.u32 (%p1243_p3), 200, %s272_s28 }
  0x1f   : > { %s1316_s6 = scalar_lea.vmem (%p1243_p3), %s1912_s1, %s1016_s29 }
  0x20   : > { %v353_v25 = vld [vmem:[%s1316_s6] sm:$0xff] (%p1243_p3)  ;;  %v355_v26 = vld [vmem:[%s1316_s6 + $0x10] sm:$0xff] (%p1243_p3)  ;;  %s1324_s7 = scalar_lea.vmem (%p1243_p3), [#allocation3], %s1075_s30 }
  0x21   : > { %v357_v27 = vld [vmem:[%s1316_s6 + $0x20] sm:$0xff] (%p1243_p3)  ;;  %v359_v28 = vld [vmem:[%s1316_s6 + $0x30] sm:$0xff] (%p1243_p3)  ;;  %354 = vst [vmem:[%s1324_s7] sm:$0xff] (%p1243_p3), %v353_v25  ;;  %356 = vst [vmem:[%s1324_s7 + $0x8] sm:$0xff] (%p1243_p3), %v355_v26 }
  0x22   : > { %v361_v29 = vld [vmem:[%s1316_s6 + $0x40] sm:$0xff]  ;;  %v363_v30 = vld [vmem:[%s1316_s6 + $0x50] sm:$0xff]  ;;  %358 = vst [vmem:[%s1324_s7 + $0x10] sm:$0xff] %v357_v27  ;;  %360 = vst [vmem:[%s1324_s7 + $0x18] sm:$0xff] %v359_v28 }
  0x23   : > { %362 = vst [vmem:[%s1324_s7 + $0x20] sm:$0xff] %v361_v29  ;;  %364 = vst [vmem:[%s1324_s7 + $0x28] sm:$0xff] %v363_v30  ;;  %v365_v31 = vld [vmem:[%s1316_s6 + $0x60] sm:$0xff]  ;;  %v367_v32 = vld [vmem:[%s1316_s6 + $0x70] sm:$0xff] }
  0x24   : > { %v369_v33 = vld [vmem:[%s1316_s6 + $0x80] sm:$0xff]  ;;  %366 = vst [vmem:[%s1324_s7 + $0x30] sm:$0xff] %v365_v31  ;;  %368 = vst [vmem:[%s1324_s7 + $0x38] sm:$0xff] %v367_v32  ;;  %v371_v34 = vld [vmem:[%s1316_s6 + $0x90] sm:$0xff] }
  0x25   : > { %370 = vst [vmem:[%s1324_s7 + $0x40] sm:$0xff] %v369_v33  ;;  %v373_v35 = vld [vmem:[%s1316_s6 + $0xa0] sm:$0xff]  ;;  %v375_v36 = vld [vmem:[%s1316_s6 + $0xb0] sm:$0xff]  ;;  %372 = vst [vmem:[%s1324_s7 + $0x48] sm:$0xff] %v371_v34 }
  0x26   : > { %374 = vst [vmem:[%s1324_s7 + $0x50] sm:$0xff] %v373_v35  ;;  %376 = vst [vmem:[%s1324_s7 + $0x58] sm:$0xff] %v375_v36  ;;  %v377_v37 = vld [vmem:[%s1316_s6 + $0xc0] sm:$0xff]  ;;  %v379_v38 = vld [vmem:[%s1316_s6 + $0xd0] sm:$0xff] }
  0x27   : > { %v381_v39 = vld [vmem:[%s1316_s6 + $0xe0] sm:$0xff]  ;;  %378 = vst [vmem:[%s1324_s7 + $0x60] sm:$0xff] %v377_v37  ;;  %380 = vst [vmem:[%s1324_s7 + $0x68] sm:$0xff] %v379_v38  ;;  %v383_v40 = vld [vmem:[%s1316_s6 + $0xf0] sm:$0xff] }
  0x28   : > { %382 = vst [vmem:[%s1324_s7 + $0x70] sm:$0xff] %v381_v39  ;;  %v385_v41 = vld [vmem:[%s1316_s6 + $0x100] sm:$0xff]  ;;  %v387_v42 = vld [vmem:[%s1316_s6 + $0x110] sm:$0xff]  ;;  %384 = vst [vmem:[%s1324_s7 + $0x78] sm:$0xff] %v383_v40 }
  0x29   : > { %386 = vst [vmem:[%s1324_s7 + $0x80] sm:$0xff] %v385_v41  ;;  %388 = vst [vmem:[%s1324_s7 + $0x88] sm:$0xff] %v387_v42  ;;  %v389_v43 = vld [vmem:[%s1316_s6 + $0x120] sm:$0xff]  ;;  %v391_v44 = vld [vmem:[%s1316_s6 + $0x130] sm:$0xff] }
  0x2a   : > { %v393_v45 = vld [vmem:[%s1316_s6 + $0x140] sm:$0xff]  ;;  %390 = vst [vmem:[%s1324_s7 + $0x90] sm:$0xff] %v389_v43  ;;  %392 = vst [vmem:[%s1324_s7 + $0x98] sm:$0xff] %v391_v44  ;;  %v395_v46 = vld [vmem:[%s1316_s6 + $0x150] sm:$0xff] }
  0x2b   : > { %394 = vst [vmem:[%s1324_s7 + $0xa0] sm:$0xff] %v393_v45  ;;  %v397_v47 = vld [vmem:[%s1316_s6 + $0x160] sm:$0xff]  ;;  %v399_v48 = vld [vmem:[%s1316_s6 + $0x170] sm:$0xff]  ;;  %396 = vst [vmem:[%s1324_s7 + $0xa8] sm:$0xff] %v395_v46 }
  0x2c   : > { %398 = vst [vmem:[%s1324_s7 + $0xb0] sm:$0xff] %v397_v47  ;;  %400 = vst [vmem:[%s1324_s7 + $0xb8] sm:$0xff] %v399_v48  ;;  %v401_v49 = vld [vmem:[%s1316_s6 + $0x180] sm:$0xff] }
  0x2d   : > { %402 = vst [vmem:[%s1324_s7 + $0xc0] sm:$0xff] %v401_v49 }
  0x2e PF: > { %p1017_p5 = scmp.ge.s32.totalorder %s1190_s14, 1  ;;  %p407_p6 = scmp.lt.s32.totalorder %s1190_s14, 3 }
  0x30   : > { %p408_p7 = pnand %p1017_p5, %p407_p6 }
  0x32   : > { %411 = sbr.rel (%p408_p7) target bundleno = 384 (0x180), region = 100 }
  0x37   : > { %s414_s8 = sand.u32 1, %s1182_s12   ;;  %v1020_v43 = vld [vmem:[%s1913_s2 + $0x10] sm:$0x7f]  ;;  %p591_p8 = scmp.lt.s32.totalorder %s1229_s15, 2 }
  0x38   : > { %s1076_s9 = smul.u32 200, %s414_s8  ;;  %p447_p9 = scmp.lt.s32.totalorder %s1229_s15, 1 }
  0x39   : > { %s592_s24 = scalar_select %p591_p8, 1, 0 }
  0x3a   : > { %s1373_s10 = scalar_lea.vmem [#allocation2], %s1076_s9  ;;  %s1378_s11 = scalar_lea.vmem [#allocation3], %s1076_s9 }
  0x3b   : > { %v1376_v50 = vld [vmem:[%s1373_s10 + $0x28] sm:$0x7f]  ;;  %v1381_v51 = vld [vmem:[%s1378_s11 + $0x28] sm:$0x7f]  ;;  %v1384_v52 = vld [vmem:[%s1373_s10 + $0x30] sm:$0x7f] }
  0x3c   : > { %v1387_v53 = vld [vmem:[%s1378_s11 + $0x30] sm:$0x7f]  ;;  %v616_v54 = vmax.f32 %v1376_v50, %v1384_v52  ;;  %v1394_v56 = vld [vmem:[%s1373_s10 + $0x38] sm:$0x7f]  ;;  %v1397_v57 = vld [vmem:[%s1378_s11 + $0x38] sm:$0x7f] }
  0x3d   : > { %v619_v55 = vmax.f32 %v1381_v51, %v1387_v53  ;;  %v1402_v60 = vld [vmem:[%s1373_s10 + $0x40] sm:$0x7f]  ;;  %v1405_v61 = vld [vmem:[%s1378_s11 + $0x40] sm:$0x7f]  ;;  %v1411_v1 = vld [vmem:[%s1373_s10 + $0x48] sm:$0x7f] }
  0x3e   : > { %v622_v58 = vmax.f32 %v616_v54, %v1394_v56  ;;  %v460_v62 = vld [vmem:[%s1373_s10] sm:$0x7f]  ;;  %v1414_v2 = vld [vmem:[%s1378_s11 + $0x48] sm:$0x7f]  ;;  %v1023_v3 = vld [vmem:[%s1373_s10 + $0x8] sm:$0x7f] }
  0x3f   : > { %v625_v59 = vmax.f32 %v619_v55, %v1397_v57  ;;  %v1418_v4 = vld [vmem:[%s1378_s11 + $0x20] sm:$0x7f]  ;;  %v478_v5 = vmul.f32 0.5, %v460_v62  ;;  %v484_v9 = vmul.f32 0.5, %v1023_v3  ;;  %v1428_v11 = vld [vmem:[%s1378_s11 + $0x50] sm:$0x7f] }
  0x40   : > { %v628_v63 = vmax.f32 %v622_v58, %v1402_v60  ;;  %v1024_v6 = vld [vmem:[%s1373_s10 + $0x10] sm:$0x7f]  ;;  %vm492_vm0 = vcmp.gt.f32.partialorder %v1418_v4, 0.0  ;;  %v1025_v12 = vld [vmem:[%s1373_s10 + $0x18] sm:$0x7f]  ;;  %v490_v45 = vmul.f32 %v1418_v4, %v1418_v4  ;;  %s1964_s15 = smov (!%p447_p9, %s1229_s15), 1 }
  0x41   : > { %v631_v0 = vmax.f32 %v625_v59, %v1405_v61  ;;  %v1425_v10 = vld [vmem:[%s1373_s10 + $0x50] sm:$0x7f]  ;;  %1104 = vtanh.f32 %v478_v5  ;;  %v493_v13 = vsel %vm492_vm0, %v1024_v6, 0.0  ;;  %v1434_v16 = vld [vmem:[%s1373_s10 + $0x58] sm:$0x7f]  ;;  %v498_v18 = vsel %vm492_vm0, %v1025_v12, 0.0 }
  0x42   : > { %v634_v7 = vmax.f32 %v628_v63, %v1411_v1  ;;  %1106 = vtanh.f32 %v484_v9  ;;  %v1437_v17 = vld [vmem:[%s1378_s11 + $0x58] sm:$0x7f]  ;;  %v494_v19 = vmul.f32 1.442695, %v493_v13  ;;  %v499_v22 = vmul.f32 1.442695, %v498_v18 }
  0x43   : > { %v637_v8 = vmax.f32 %v631_v0, %v1414_v2  ;;  %v1442_v23 = vld [vmem:[%s1373_s10 + $0x60] sm:$0x7f]  ;;  %v1445_v24 = vld [vmem:[%s1378_s11 + $0x60] sm:$0x7f]  ;;  %v1448_v25 = vld [vmem:[%s1373_s10 + $0x68] sm:$0x7f] }
  0x44   : > { %v640_v14 = vmax.f32 %v634_v7, %v1425_v10  ;;  %1108 = vpow2.f32 %v494_v19  ;;  %v1451_v26 = vld [vmem:[%s1378_s11 + $0x68] sm:$0x7f]  ;;  %v1456_v29 = vld [vmem:[%s1373_s10 + $0x70] sm:$0x7f]  ;;  %v1459_v30 = vld [vmem:[%s1378_s11 + $0x70] sm:$0x7f]  ;;  %v491_v7 = vmul.f32 %v1020_v43, %v490_v45 }
  0x45   : > { %v643_v15 = vmax.f32 %v637_v8, %v1428_v11  ;;  %1110 = vpow2.f32 %v499_v22  ;;  %v1464_v33 = vld [vmem:[%s1378_s11 + $0x10] sm:$0x7f]  ;;  %v1467_v34 = vld [vmem:[%s1373_s10 + $0x78] sm:$0x7f]  ;;  %v1470_v35 = vld [vmem:[%s1378_s11 + $0x78] sm:$0x7f] }
  0x46   : > { %v646_v20 = vmax.f32 %v640_v14, %v1434_v16  ;;  %v1029_v37 = vld [vmem:[%s1378_s11 + $0x18] sm:$0x7f]  ;;  %v1476_v40 = vld [vmem:[%s1373_s10 + $0x80] sm:$0x7f]  ;;  %v1479_v41 = vld [vmem:[%s1378_s11 + $0x80] sm:$0x7f] }
  0x47   : > { %v649_v21 = vmax.f32 %v643_v15, %v1437_v17  ;;  %v1485_v44 = vld [vmem:[%s1378_s11] sm:$0x7f]  ;;  %v508_v46 = vmul.f32 0.5, %v1464_v33  ;;  %v511_v54 = vmul.f32 0.5, %v1029_v37  ;;  %v1493_v55 = vld [vmem:[%s1373_s10 + $0x88] sm:$0x7f] }
  0x48   : > { %v652_v27 = vmax.f32 %v646_v20, %v1442_v23  ;;  %1924 = vst [vmem:[#allocation4_spill] sm:$0xff] %v1485_v44  ;;  %v1496_v58 = vld [vmem:[%s1378_s11 + $0x88] sm:$0x7f]  ;;  %v1504_v3 = vld [vmem:[%s1373_s10 + $0x90] sm:$0x7f]  ;;  %s1018_s27 = sshll.u32 %s1964_s15, 3 }
  0x49   : > { %v655_v28 = vmax.f32 %v649_v21, %v1445_v24  ;;  %v1499_v59 = vld [vmem:[%s1378_s11 + $0x8] sm:$0x7f]  ;;  %v1507_v5 = vld [vmem:[%s1378_s11 + $0x90] sm:$0x7f]  ;;  %v1513_v8 = vsub.f32 %v1485_v44, %v508_v46  ;;  %v1518_v14 = vadd.f32 %v508_v46, %v1485_v44  ;;  %v1530_v20 = vld [vmem:[%s1378_s11 + $0x98] sm:$0x7f]  ;;  %s450_s30 = scalar_lea.vmem %s1914_s3, %s1018_s27 }
  0x4a   : > { %v658_v31 = vmax.f32 %v652_v27, %v1448_v25  ;;  %1925 = vst [vmem:[#allocation5_spill] sm:$0xff] %v1499_v59  ;;  %v1021_v6 = vld [vmem:[%s1913_s2 + $0x18] sm:$0x7f]  ;;  %v1521_v15 = vsub.f32 %v1499_v59, %v511_v54  ;;  %v1524_v18 = vadd.f32 %v1499_v59, %v511_v54  ;;  %v451_v22 = vld [vmem:[%s1913_s2] sm:$0x7f] }
  0x4b   : > { %v661_v32 = vmax.f32 %v655_v28, %v1451_v26  ;;  %v1527_v19 = vld [vmem:[%s1373_s10 + $0x98] sm:$0x7f]  ;;  %v550_v43 = vand.u32 2147483647, %v1464_v33  ;;  %v570_v46 = vand.u32 2147483647, %v1029_v37  ;;  %v527_v54 = vsub.f32 %v1518_v14, %v1513_v8 }
  0x4c   : > { %v664_v38 = vmax.f32 %v658_v31, %v1456_v29 }
  0x4d   : > { %v667_v39 = vmax.f32 %v661_v32, %v1459_v30  ;;  %v497_v32 = vmul.f32 %v1021_v6, %v490_v45  ;;  %v1562_v6 = vld [vmem:[%s1373_s10 + $0x20] sm:$0x7f] }
  0x4e   : > { %v1105_v36 = vpop.eup %1104  ;;  %v670_v47 = vmax.f32 %v664_v38, %v1467_v34  ;;  %v1541_v38 = vld [vmem:[%s1378_s11 + $0xa0] sm:$0x7f] }
  0x4f   : > { %v1107_v42 = vpop.eup %1106  ;;  %v673_v48 = vmax.f32 %v667_v39, %v1470_v35  ;;  %v480_v49 = vadd.f32 1.0, %v1105_v36  ;;  %v1538_v36 = vld [vmem:[%s1373_s10 + $0xa0] sm:$0x7f] }
  0x50   : > { %v676_v62 = vmax.f32 %v670_v47, %v1476_v40  ;;  %v486_v0 = vadd.f32 1.0, %v1107_v42  ;;  %v1019_v42 = vld [vmem:[%s1913_s2 + $0x8] sm:$0x7f] }
  0x51   : > { %v679_v63 = vmax.f32 %v673_v48, %v1479_v41  ;;  %v481_v13 = vmul.f32 0.5, %v480_v49  ;;  %v1109_v21 = vpop.eup %1108 }
  0x52   : > { %v682_v9 = vmax.f32 %v676_v62, %v1493_v55  ;;  %v487_v31 = vmul.f32 0.5, %v486_v0  ;;  %v1111_v39 = vpop.eup %1110  ;;  %v496_v49 = vmul.f32 %v1109_v21, %v491_v7  ;;  %v528_v62 = vsub.f32 %v1524_v18, %v1521_v15  ;;  %v1557_v0 = vld [vmem:[%s1378_s11 + $0xa8] sm:$0x7f] }
  0x53   : > { %v685_v12 = vmax.f32 %v679_v63, %v1496_v58  ;;  %v482_v45 = vadd.f32 %v481_v13, %v451_v22  ;;  %v1554_v63 = vld [vmem:[%s1373_s10 + $0xa8] sm:$0x7f]  ;;  %1926 = vst [vmem:[#allocation6_spill] sm:$0xff] %v1557_v0  ;;  %v1564_v7 = vmul.f32 %v1111_v39, %v497_v32  ;;  %v1570_v13 = vld [vmem:[%s1378_s11 + $0xb0] sm:$0x7f] }
  0x54   : > { %v688_v27 = vmax.f32 %v682_v9, %v1504_v3  ;;  %v488_v9 = vadd.f32 %v1019_v42, %v487_v31  ;;  %1927 = vst [vmem:[#allocation7_spill] sm:$0xff] %v1570_v13  ;;  %v1572_v21 = vadd.f32 1e-32, %v550_v43  ;;  %v1574_v22 = vadd.f32 1e-32, %v570_v46 }
  0x55   : > { %v691_v28 = vmax.f32 %v685_v12, %v1507_v5  ;;  %v1567_v12 = vld [vmem:[%s1373_s10 + $0xb0] sm:$0x7f]  ;;  %v502_v31 = vmul.f32 0.5, %v496_v49  ;;  %v1581_v32 = vmul.f32 %v528_v62, %v527_v54  ;;  %v1584_v39 = vld [vmem:[%s1373_s10 + $0xb8] sm:$0x7f]  ;;  %v600_v43 = vmul.f32 0.5, %v1562_v6 }
  0x56   : > { %v694_v47 = vmax.f32 %v688_v27, %v1527_v19  ;;  %v1587_v42 = vld [vmem:[%s1378_s11 + $0xb8] sm:$0x7f]  ;;  %v1600_v54 = vld [vmem:[%s1378_s11 + $0xc0] sm:$0x7f]  ;;  %1112 = vrsqrt.f32 %v1572_v21 }
  0x57   : > { %v697_v48 = vmax.f32 %v691_v28, %v1530_v20  ;;  %1929 = vst [vmem:[#allocation9_spill] sm:$0xff] %v1587_v42  ;;  %1930 = vst [vmem:[#allocation10_spill] sm:$0xff] %v1600_v54  ;;  %1114 = vrsqrt.f32 %v1574_v22 }
  0x58   : > { %v700_v33 = vmax.f32 %v694_v47, %v1538_v36  ;;  %v1579_v47 = vmul.f32 %v1418_v4, %v482_v45  ;;  %v505_v45 = vmul.f32 0.5, %v1564_v7  ;;  %1116 = vtanh.f32 %v600_v43 }
  0x59   : > { %v703_v37 = vmax.f32 %v697_v48, %v1541_v38  ;;  %v541_v48 = vand.u32 2147483647, %v496_v49 }
  0x5a   : > { %v706_v27 = vmax.f32 %v700_v33, %v1554_v63  ;;  %1928 = vst [vmem:[#allocation8_spill] sm:$0xff] %v1579_v47  ;;  %v1593_v33 = vmul.f32 %v1418_v4, %v488_v9  ;;  %v1606_v44 = vadd.f32 %v502_v31, %v1579_v47 }
  0x5b   : > { %v709_v28 = vmax.f32 %v703_v37, %v1557_v0  ;;  %v1597_v37 = vld [vmem:[%s1373_s10 + $0xc0] sm:$0x7f] }
  0x5c   : > { %v712_v46 = vmax.f32 %v706_v27, %v1567_v12 }
  0x5d   : > { %v715_v59 = vmax.f32 %v709_v28, %v1570_v13  ;;  %v1617_v13 = vsub.f32 %v1579_v47, %v502_v31  ;;  %v507_v31 = vadd.f32 %v505_v45, %v1593_v33 }
  0x5e   : > { %v718_v62 = vmax.f32 %v712_v46, %v1584_v39  ;;  %v1620_v46 = vsub.f32 %v1593_v33, %v505_v45 }
  0x5f   : > { %v721_v49 = vmax.f32 %v715_v59, %v1587_v42  ;;  %v1622_v59 = vadd.f32 1e-32, %v541_v48  ;;  %v514_v48 = vmin.f32 %v1606_v44, %v1518_v14  ;;  %v515_v0 = vmax.f32 %v1617_v13, %v1513_v8 }
  0x60   : > { %v1611_v27 = vmax.f32 %v718_v62, %v1597_v37 }
  0x61   : > { %v1614_v28 = vmax.f32 %v721_v49, %v1600_v54  ;;  %v1192_v49 = vmov 0.0  }
  0x62   : > { %v728_v9 = vsub.f32 %v1376_v50, %v1611_v27  ;;  %v737_v43 = vsub.f32 %v1384_v52, %v1611_v27 }
  0x63   : > { %vm732_vm1 = vcmp.ge.f32.partialorder %v1381_v51, %v1614_v28  ;;  %vm741_vm2 = vcmp.ge.f32.partialorder %v1387_v53, %v1614_v28  ;;  %v746_v51 = vsub.f32 %v1394_v56, %v1611_v27  ;;  %v523_v53 = vsub.f32 %v1606_v44, %v1617_v13 }
  0x64   : > { %v735_v62 = vsel %vm732_vm1, %v1376_v50, 0.0  ;;  %v736_v42 = vsel %vm732_vm1, 1.0, %v1192_v49  ;;  %v729_v54 = vmul.f32 1.442695, %v728_v9  ;;  %v738_v47 = vmul.f32 1.442695, %v737_v43 }
  0x65   : > { %vm742_vm3 = vcmp.lt.f32.partialorder %v736_v42, 0.5  ;;  %vm750_vm5 = vcmp.ge.f32.partialorder %v1397_v57, %v1614_v28  ;;  %v755_v50 = vsub.f32 %v1402_v60, %v1611_v27  ;;  %v747_v9 = vmul.f32 1.442695, %v746_v51  ;;  %v1669_v51 = vpop.eup %1112 }
  0x66   : > { %vm1644_vm4 = vmand %vm741_vm2, %vm742_vm3  ;;  %1118 = vpow2.f32 %v729_v54  ;;  %v764_v13 = vsub.f32 %v1411_v1, %v1611_v27  ;;  %v518_v57 = vmin.f32 %v507_v31, %v1524_v18  ;;  %vm759_vm8 = vcmp.ge.f32.partialorder %v1405_v61, %v1614_v28  ;;  %v1681_v45 = vpop.eup %1114 }
  0x67   : > { %v744_v14 = vsel %vm1644_vm4, %v1384_v52, %v735_v62  ;;  %v745_v8 = vsel %vm1644_vm4, 1.0, %v736_v42  ;;  %1120 = vpow2.f32 %v738_v47  ;;  %v756_v44 = vmul.f32 1.442695, %v755_v50 }
  0x68   : > { %vm751_vm6 = vcmp.lt.f32.partialorder %v745_v8, 0.5  ;;  %1122 = vpow2.f32 %v747_v9  ;;  %v773_v52 = vsub.f32 %v1425_v10, %v1611_v27  ;;  %v765_v47 = vmul.f32 1.442695, %v764_v13 }
  0x69   : > { %vm752_vm7 = vmand %vm750_vm5, %vm751_vm6  ;;  %1124 = vpow2.f32 %v756_v44  ;;  %v519_v43 = vmax.f32 %v1620_v46, %v1521_v15  ;;  %v782_v18 = vsub.f32 %v1434_v16, %v1611_v27  ;;  %vm768_vm11 = vcmp.ge.f32.partialorder %v1414_v2, %v1614_v28  ;;  %v1689_v44 = vpop.eup %1116 }
  0x6a   : > { %v753_v54 = vsel %vm752_vm7, %v1394_v56, %v744_v14  ;;  %v754_v42 = vsel %vm752_vm7, 1.0, %v745_v8  ;;  %v774_v62 = vmul.f32 1.442695, %v773_v52  ;;  %1126 = vpow2.f32 %v765_v47 }
  0x6b   : > { %vm760_vm9 = vcmp.lt.f32.partialorder %v754_v42, 0.5  ;;  %v791_v56 = vsub.f32 %v1442_v23, %v1611_v27  ;;  %v800_v15 = vsub.f32 %v1448_v25, %v1611_v27  ;;  %v524_v50 = vsub.f32 %v507_v31, %v1620_v46 }
  0x6c   : > { %vm1671_vm10 = vmand %vm759_vm8, %vm760_vm9  ;;  %v783_v9 = vmul.f32 1.442695, %v782_v18  ;;  %v516_v2 = vsub.f32 %v514_v48, %v515_v0  ;;  %1128 = vpow2.f32 %v774_v62  ;;  %v520_v52 = vsub.f32 %v518_v57, %v519_v43 }
  0x6d   : > { %v762_v14 = vsel %vm1671_vm10, %v1402_v60, %v753_v54  ;;  %v763_v8 = vsel %vm1671_vm10, 1.0, %v754_v42  ;;  %v792_v13 = vmul.f32 1.442695, %v791_v56  ;;  %vm777_vm14 = vcmp.ge.f32.partialorder %v1428_v11, %v1614_v28 }
  0x6e   : > { %vm769_vm12 = vcmp.lt.f32.partialorder %v763_v8, 0.5  ;;  %v801_v46 = vmul.f32 1.442695, %v800_v15  ;;  %v809_v31 = vsub.f32 %v1456_v29, %v1611_v27  ;;  %1130 = vpow2.f32 %v783_v9 }
  0x6f   : > { %vm770_vm13 = vmand %vm768_vm11, %vm769_vm12  ;;  %v818_v42 = vsub.f32 %v1467_v34, %v1611_v27  ;;  %v525_v0 = vmul.f32 %v524_v50, %v523_v53  ;;  %1132 = vrsqrt.f32 %v1622_v59  ;;  %v1935_v57 = vand.u32 2147483647, %v1564_v7 }
  0x70   : > { %v771_v60 = vsel %vm770_vm13, %v1411_v1, %v762_v14  ;;  %v772_v54 = vsel %vm770_vm13, 1.0, %v763_v8  ;;  %v810_v48 = vmul.f32 1.442695, %v809_v31  ;;  %vm786_vm1 = vcmp.ge.f32.partialorder %v1437_v17, %v1614_v28 }
  0x71   : > { %vm778_vm15 = vcmp.lt.f32.partialorder %v772_v54, 0.5  ;;  %v1701_v47 = vadd.f32 1e-32, %v1935_v57  ;;  %1134 = vpow2.f32 %v792_v13  ;;  %v827_v1 = vsub.f32 %v1476_v40, %v1611_v27 }
  0x72   : > { %vm1703_vm0 = vmand %vm777_vm14, %vm778_vm15  ;;  %v517_v53 = vmax.f32 %v516_v2, 0.0  ;;  %v836_v62 = vsub.f32 %v1493_v55, %v1611_v27  ;;  %v521_v61 = vmax.f32 %v520_v52, 0.0  ;;  %1136 = vpow2.f32 %v801_v46 }
  0x73   : > { %v780_v43 = vsel %vm1703_vm0, %v1425_v10, %v771_v60  ;;  %v781_v7 = vsel %vm1703_vm0, 1.0, %v772_v54  ;;  %v1119_v18 = vpop.eup %1118  ;;  %v819_v17 = vmul.f32 1.442695, %v818_v42  ;;  %v526_v15 = vand.u32 2147483647, %v525_v0 }
  0x74   : > { %vm787_vm2 = vcmp.lt.f32.partialorder %v781_v7, 0.5  ;;  %v1121_v56 = vpop.eup %1120  ;;  %vm795_vm4 = vcmp.ge.f32.partialorder %v1445_v24, %v1614_v28  ;;  %1138 = vpow2.f32 %v810_v48  ;;  %v845_v10 = vsub.f32 %v1504_v3, %v1611_v27 }
  0x75   : > { %vm788_vm3 = vmand %vm786_vm1, %vm787_vm2  ;;  %v1123_v50 = vpop.eup %1122  ;;  %v740_v14 = vadd.f32 %v1121_v56, %v1119_v18  ;;  %v828_v2 = vmul.f32 1.442695, %v827_v1  ;;  %1140 = vrsqrt.f32 %v1701_v47  ;;  %v837_v52 = vmul.f32 1.442695, %v836_v62 }
  0x76   : > { %v789_v8 = vsel %vm788_vm3, %v1434_v16, %v780_v43  ;;  %v790_v9 = vsel %vm788_vm3, 1.0, %v781_v7  ;;  %v1125_v13 = vpop.eup %1124  ;;  %v854_v46 = vsub.f32 %v1527_v19, %v1611_v27  ;;  %v1726_v31 = vmul.f32 %v521_v61, %v517_v53 }
  0x77   : > { %vm796_vm5 = vcmp.lt.f32.partialorder %v790_v9, 0.5  ;;  %v749_v60 = vadd.f32 %v1123_v50, %v740_v14  ;;  %vm804_vm7 = vcmp.ge.f32.partialorder %v1451_v26, %v1614_v28  ;;  %1142 = vpow2.f32 %v819_v17  ;;  %v1127_v16 = vpop.eup %1126 }
  0x78   : > { %vm1731_vm6 = vmand %vm795_vm4, %vm796_vm5  ;;  %v1940_v42 = vand.u32 2147483647, %v1581_v32  ;;  %v863_v24 = vsub.f32 %v1538_v36, %v1611_v27  ;;  %1144 = vpow2.f32 %v828_v2  ;;  %v846_v1 = vmul.f32 1.442695, %v845_v10 }
  0x79   : > { %v798_v48 = vsel %vm1731_vm6, %v1442_v23, %v789_v8  ;;  %v799_v57 = vsel %vm1731_vm6, 1.0, %v790_v9  ;;  %v758_v11 = vadd.f32 %v1125_v13, %v749_v60  ;;  %v1129_v26 = vpop.eup %1128  ;;  %vm813_vm10 = vcmp.ge.f32.partialorder %v1459_v30, %v1614_v28 }
  0x7a   : > { %v531_v0 = vadd.f32 %v1940_v42, %v526_v15  ;;  %vm805_vm8 = vcmp.lt.f32.partialorder %v799_v57, 0.5  ;;  %1146 = vpow2.f32 %v837_v52  ;;  %v855_v32 = vmul.f32 1.442695, %v854_v46 }
  0x7b   : > { %vm806_vm9 = vmand %vm804_vm7, %vm805_vm8  ;;  %v767_v53 = vadd.f32 %v1127_v16, %v758_v11  ;;  %v872_v7 = vsub.f32 %v1554_v63, %v1611_v27  ;;  %v1131_v62 = vpop.eup %1130  ;;  %v864_v61 = vmul.f32 1.442695, %v863_v24  ;;  %v881_v17 = vsub.f32 %v1567_v12, %v1611_v27 }
  0x7c   : > { %v807_v23 = vsel %vm806_vm9, %v1448_v25, %v798_v48  ;;  %v808_v43 = vsel %vm806_vm9, 1.0, %v799_v57  ;;  %v532_v18 = vsub.f32 %v531_v0, %v1726_v31  ;;  %v1754_v56 = vpop.eup %1132  ;;  %vm822_vm13 = vcmp.ge.f32.partialorder %v1470_v35, %v1614_v28 }
  0x7d   : > { %vm814_vm11 = vcmp.lt.f32.partialorder %v808_v43, 0.5  ;;  %v776_v30 = vadd.f32 %v1129_v26, %v767_v53  ;;  %1148 = vpow2.f32 %v846_v1  ;;  %v583_v10 = vmul.f32 %v1418_v4, %v1562_v6 }
  0x7e   : > { %vm1756_vm12 = vmand %vm813_vm10, %vm814_vm11  ;;  %v1135_v25 = vpop.eup %1134  ;;  %1150 = vpow2.f32 %v855_v32  ;;  %v873_v9 = vmul.f32 1.442695, %v872_v7  ;;  %v890_v2 = vsub.f32 %v1584_v39, %v1611_v27  ;;  %v533_v13 = vadd.f32 1e-06, %v532_v18 }
  0x7f   : > { %v816_v50 = vsel %vm1756_vm12, %v1456_v29, %v807_v23  ;;  %v817_v14 = vsel %vm1756_vm12, 1.0, %v808_v43  ;;  %v785_v8 = vadd.f32 %v1131_v62, %v776_v30  ;;  %v1137_v35 = vpop.eup %1136  ;;  %vm831_vm0 = vcmp.ge.f32.partialorder %v1479_v41, %v1614_v28 }
  0x80   : > { %vm823_vm14 = vcmp.lt.f32.partialorder %v817_v14, 0.5  ;;  %1152 = vpow2.f32 %v864_v61  ;;  %v882_v6 = vmul.f32 1.442695, %v881_v17  ;;  %v899_v54 = vsub.f32 %v1597_v37, %v1611_v27 }
  0x81   : > { %vm824_vm15 = vmand %vm822_vm13, %vm823_vm14  ;;  %v1139_v52 = vpop.eup %1138  ;;  %v794_v29 = vadd.f32 %v1135_v25, %v785_v8  ;;  %v584_v16 = vmul.f32 0.5, %v583_v10  ;;  %vm840_vm3 = vcmp.ge.f32.partialorder %v1496_v58, %v1614_v28  ;;  %1154 = vpow2.f32 %v873_v9  ;;  %v1949_v9 = vld [vmem:[#allocation6_spill] sm:$0xff] }
  0x82   : > { %v825_v46 = vsel %vm824_vm15, %v1467_v34, %v816_v50  ;;  %v826_v60 = vsel %vm824_vm15, 1.0, %v817_v14  ;;  %v1141_v42 = vpop.eup %1140  ;;  %v891_v41 = vmul.f32 1.442695, %v890_v2  ;;  %1156 = vrcp.f32 %v533_v13 }
  0x83   : > { %vm832_vm1 = vcmp.lt.f32.partialorder %v826_v60, 0.5  ;;  %v803_v0 = vadd.f32 %v1137_v35, %v794_v29  ;;  %1158 = vpow2.f32 %v882_v6  ;;  %v900_v1 = vmul.f32 1.442695, %v899_v54  ;;  %v1950_v54 = vld [vmem:[#allocation4_spill] sm:$0xff] }
  0x84   : > { %vm1776_vm2 = vmand %vm831_vm0, %vm832_vm1  ;;  %v1143_v57 = vpop.eup %1142  ;;  %v553_v32 = vmul.f32 %v1669_v51, %v1572_v21  ;;  %1160 = vtanh.f32 %v584_v16  ;;  %vm849_vm6 = vcmp.ge.f32.partialorder %v1507_v5, %v1614_v28  ;;  %vm554_vm7 = vcmp.eq.f32.partialorder %v1572_v21, inf  ;;  %v1951_v16 = vld [vmem:[#allocation8_spill] sm:$0xff] }
  0x85   : > { %v834_v34 = vsel %vm1776_vm2, %v1476_v40, %v825_v46  ;;  %v835_v24 = vsel %vm1776_vm2, 1.0, %v826_v60  ;;  %v812_v11 = vadd.f32 %v1139_v52, %v803_v0  ;;  %v1145_v26 = vpop.eup %1144  ;;  %1162 = vpow2.f32 %v891_v41 }
  0x86   : > { %vm841_vm4 = vcmp.lt.f32.partialorder %v835_v24, 0.5  ;;  %vm556_vm8 = vcmp.eq.f32.partialorder %v1572_v21, 0.0  ;;  %v557_v43 = vand.u32 2147483648, %v1572_v21  ;;  %vm858_vm11 = vcmp.ge.f32.partialorder %v1530_v20, %v1614_v28 }
  0x87   : > { %vm842_vm5 = vmand %vm840_vm3, %vm841_vm4  ;;  %v1147_v58 = vpop.eup %1146  ;;  %v821_v53 = vadd.f32 %v1143_v57, %v812_v11  ;;  %1164 = vpow2.f32 %v900_v1  ;;  %vm574_vm12 = vcmp.eq.f32.partialorder %v1574_v22, inf  ;;  %vm576_vm13 = vcmp.eq.f32.partialorder %v1574_v22, 0.0 }
  0x88   : > { %v843_v40 = vsel %vm842_vm5, %v1493_v55, %v834_v34  ;;  %v844_v23 = vsel %vm842_vm5, 1.0, %v835_v24  ;;  %v555_v61 = vsel %vm554_vm7, %v1572_v21, %v553_v32  ;;  %v577_v17 = vand.u32 2147483648, %v1574_v22 }
  0x89   : > { %vm850_vm9 = vcmp.lt.f32.partialorder %v844_v23, 0.5  ;;  %v830_v7 = vadd.f32 %v1145_v26, %v821_v53  ;;  %v544_v15 = vmul.f32 %v1754_v56, %v1622_v59  ;;  %vm545_vm15 = vcmp.eq.f32.partialorder %v1622_v59, inf }
  0x8a   : > { %vm1795_vm10 = vmand %vm849_vm6, %vm850_vm9  ;;  %v1149_v5 = vpop.eup %1148  ;;  %v573_v25 = vmul.f32 %v1681_v45, %v1574_v22  ;;  %vm867_vm1 = vcmp.ge.f32.partialorder %v1541_v38, %v1614_v28  ;;  %v564_v10 = vmul.f32 %v1141_v42, %v1701_v47  ;;  %vm547_vm2 = vcmp.eq.f32.partialorder %v1622_v59, 0.0 }
  0x8b   : > { %v852_v55 = vsel %vm1795_vm10, %v1504_v3, %v843_v40  ;;  %v853_v62 = vsel %vm1795_vm10, 1.0, %v844_v23  ;;  %v1151_v18 = vpop.eup %1150  ;;  %v839_v30 = vadd.f32 %v1147_v58, %v830_v7  ;;  %vm565_vm3 = vcmp.eq.f32.partialorder %v1701_v47, inf  ;;  %v1953_v40 = vld [vmem:[#allocation5_spill] sm:$0xff] }
  0x8c   : > { %vm859_vm14 = vcmp.lt.f32.partialorder %v853_v62, 0.5  ;;  %v602_v45 = vadd.f32 1.0, %v1689_v44  ;;  %v548_v20 = vand.u32 2147483648, %v1622_v59  ;;  %vm567_vm5 = vcmp.eq.f32.partialorder %v1701_v47, 0.0 }
  0x8d   : > { %vm860_vm0 = vmand %vm858_vm11, %vm859_vm14  ;;  %v1153_v3 = vpop.eup %1152  ;;  %v848_v50 = vadd.f32 %v1149_v5, %v839_v30  ;;  %vm876_vm7 = vcmp.ge.f32.partialorder %v1949_v9, %v1614_v28  ;;  %v568_v2 = vand.u32 2147483648, %v1701_v47  ;;  %v575_v44 = vsel %vm574_vm12, %v1574_v22, %v573_v25 }
  0x8e   : > { %v861_v14 = vsel %vm860_vm0, %v1527_v19, %v852_v55  ;;  %v862_v8 = vsel %vm860_vm0, 1.0, %v853_v62  ;;  %v1155_v19 = vpop.eup %1154  ;;  %v546_v52 = vsel %vm545_vm15, %v1622_v59, %v544_v15  ;;  %v566_v29 = vsel %vm565_vm3, %v1701_v47, %v564_v10  ;;  %v1956_v59 = vld [vmem:[#allocation9_spill] sm:$0xff]  ;;  %v1957_v62 = vld [vmem:[#allocation10_spill] sm:$0xff] }
  0x8f   : > { %vm868_vm4 = vcmp.lt.f32.partialorder %v862_v8, 0.5  ;;  %v857_v56 = vadd.f32 %v1151_v18, %v848_v50  ;;  %v1157_v6 = vpop.eup %1156  ;;  %v536_v42 = vsub.f32 %v1951_v16, %v1950_v54  ;;  %v599_v0 = vsub.f32 1.0, %v1418_v4 }
  0x90   : > { %vm1827_vm6 = vmand %vm867_vm1, %vm868_vm4  ;;  %v1159_v60 = vpop.eup %1158  ;;  %v603_v48 = vmul.f32 0.5, %v602_v45  ;;  %v558_v57 = vsel %vm556_vm8, %v557_v43, %v555_v61  ;;  %v549_v26 = vsel %vm547_vm2, %v548_v20, %v546_v52  ;;  %v569_v32 = vsel %vm567_vm5, %v568_v2, %v566_v29 }
  0x91   : > { %v870_v35 = vsel %vm1827_vm6, %v1538_v36, %v861_v14  ;;  %v871_v13 = vsel %vm1827_vm6, 1.0, %v862_v8  ;;  %v866_v46 = vadd.f32 %v1153_v3, %v857_v56  ;;  %v1952_v36 = vld [vmem:[#allocation7_spill] sm:$0xff]  ;;  %v1161_v41 = vpop.eup %1160  ;;  %v578_v58 = vsel %vm576_vm13, %v577_v17, %v575_v44  ;;  %v1022_v44 = vld [vmem:[%s1913_s2 + $0x20] sm:$0x7f] }
  0x92   : > { %vm877_vm9 = vcmp.lt.f32.partialorder %v871_v13, 0.5  ;;  %vm885_vm11 = vcmp.ge.f32.partialorder %v1952_v36, %v1614_v28  ;;  %v1163_v1 = vpop.eup %1162  ;;  %v535_v53 = vmul.f32 %v1157_v6, %v1726_v31  ;;  %v538_v21 = vsub.f32 %v1593_v33, %v1953_v40 }
  0x93   : > { %vm878_vm10 = vmand %vm876_vm7, %vm877_vm9  ;;  %v875_v34 = vadd.f32 %v1155_v19, %v866_v46  ;;  %vm894_vm14 = vcmp.ge.f32.partialorder %v1956_v59, %v1614_v28  ;;  %v586_v47 = vadd.f32 1.0, %v1161_v41  ;;  %v604_v7 = vsub.f32 1.0, %v603_v48 }
  0x94   : > { %v879_v24 = vsel %vm878_vm10, %v1554_v63, %v870_v35  ;;  %v880_v11 = vsel %vm878_vm10, 1.0, %v871_v13  ;;  %v1165_v43 = vpop.eup %1164  ;;  %v559_v33 = vsub.f32 %v549_v26, %v558_v57  ;;  %v579_v51 = vsub.f32 %v569_v32, %v578_v58 }
  0x95   : > { %vm886_vm12 = vcmp.lt.f32.partialorder %v880_v11, 0.5  ;;  %v884_v23 = vadd.f32 %v1159_v60, %v875_v34  ;;  %v537_v55 = vmul.f32 %v536_v42, %v536_v42  ;;  %vm903_vm0 = vcmp.ge.f32.partialorder %v1957_v62, %v1614_v28 }
  0x96   : > { %vm1866_vm8 = vmand %vm885_vm11, %vm886_vm12  ;;  %vm596_vm1 = vcmp.lt.f32.partialorder %v535_v53, 0.6  ;;  %v539_v30 = vmul.f32 %v538_v21, %v538_v21  ;;  %v587_v15 = vmul.f32 0.5, %v586_v47  ;;  %v560_v25 = vmul.f32 %v559_v33, %v559_v33 }
  0x97   : > { %v888_v22 = vsel %vm1866_vm8, %v1567_v12, %v879_v24  ;;  %v889_v31 = vsel %vm1866_vm8, 1.0, %v880_v11  ;;  %v893_v5 = vadd.f32 %v1163_v1, %v884_v23  ;;  %v605_v12 = vmul.f32 %v604_v7, %v599_v0 }
  0x98   : > { %vm895_vm13 = vcmp.lt.f32.partialorder %v889_v31, 0.5  ;;  %v580_v3 = vmul.f32 %v579_v51, %v579_v51  ;;  %v582_v10 = vmul.f32 %v1418_v4, %v535_v53  ;;  %v1031_v28 = vsel %vm596_vm1, 1.0, %v1192_v49 }
  0x99   : > { %vm896_vm15 = vmand %vm894_vm14, %vm895_vm13  ;;  %v902_v17 = vadd.f32 %v1165_v43, %v893_v5  ;;  %v540_v14 = vadd.f32 %v539_v30, %v537_v55  ;;  %v606_v20 = vmul.f32 %v1031_v28, %v605_v12  ;;  %v593_v56 = vstv %s592_s24 }
  0x9a   : > { %v897_v18 = vsel %vm896_vm15, %v1584_v39, %v888_v22  ;;  %v898_v61 = vsel %vm896_vm15, 1.0, %v889_v31  ;;  %v581_v8 = vadd.f32 %v580_v3, %v560_v25  ;;  %v588_v45 = vmul.f32 %v587_v15, %v582_v10 }
  0x9b   : > { %vm904_vm2 = vcmp.lt.f32.partialorder %v898_v61, 0.5  ;;  %1166 = vlog2.f32 %v902_v17  ;;  %v607_v9 = vsub.f32 %v599_v0, %v606_v20  ;;  %v912_v19 = vmul.f32 5.0, %v540_v14 }
  0x9c   : > { %vm1882_vm3 = vmand %vm903_vm0, %vm904_vm2  ;;  %v589_v38 = vsub.f32 %v1418_v4, %v588_v45  ;;  %v913_v2 = vmul.f32 5.0, %v581_v8  ;;  %vm594_vm4 = vcmp.eq.s32.totalorder %v593_v56, 1  ;;  %vm920_vm5 = vcmask 1046528  }
  0x9d   : > { %v906_v39 = vsel %vm1882_vm3, %v1597_v37, %v897_v18  ;;  %v608_v35 = vmul.f32 %v607_v9, %v607_v9  ;;  %v595_v6 = vsel %vm594_vm4, %v1022_v44, 0.0 }
  0x9e   : > { %v590_v49 = vmul.f32 %v589_v38, %v589_v38  ;;  %v914_v13 = vadd.f32 %v913_v2, %v912_v19 }
  0x9f   : > { %v609_v29 = vmul.f32 %v608_v35, %v595_v6 }
  0xa0   : > { %v915_v60 = vadd.f32 %v914_v13, %v590_v49 }
  0xa2   : > { %v916_v42 = vadd.f32 %v915_v60, %v609_v29 }
  0xa8   : > { %v1167_v37 = vpop.eup %1166 }
  0xa9   : > { %v908_v52 = vmul.f32 0.6931472, %v1167_v37 }
  0xab   : > { %v909_v46 = vadd.f32 %v908_v52, %v1611_v27 }
  0xad   : > { %v910_v54 = vsub.f32 %v909_v46, %v906_v39 }
  0xaf   : > { %v911_v16 = vmul.f32 %v1418_v4, %v910_v54 }
  0xb1   : > { %v917_v0 = vmul.f32 0.000591716, %v911_v16 }
  0xb3   : > { %v918_v48 = vadd.f32 %v917_v0, %v916_v42 }
  0xb5   : > { %v921_v36 = vsel %vm920_vm5, %v918_v48, 0.0 }
  0xb6   : > { %922 = vadd.xlane.f32.xlu0 %v921_v36 }
 0x13f   : > { %v923_v41 = vpop.xlane.xlu0 %922 }
 0x140   : > { %v924_v57 = vrot.slane %v923_v41, 4 }
 0x142   : > { %v925_v34 = vadd.f32 %v924_v57, %v923_v41 }
 0x144   : > { %v926_v24 = vrot.slane %v925_v34, 2 }
 0x146   : > { %v927_v11 = vadd.f32 %v926_v24, %v925_v34 }
 0x148   : > { %v928_v1 = vrot.slane %v927_v11, 1 }
 0x14a   : > { %v929_v26 = vadd.f32 %v928_v1, %v927_v11 }
 0x14c   : > { %1077 = vpush %v929_v26 }
 0x17d   : > { %s1078_s4 = spop %1077 }
 0x17e   : > { %v931_v4 = vstv %s1078_s4 }
 0x17f   : > { %933 = vst [vmem:[%s450_s30] sm:$0xff] %v931_v4 }
 0x180 PF: > { %p10_p10 = scmp.ge.s32.totalorder %s1232_s16, 4   ;;  %s1960_s12 = smov %s1186_s13 }
 0x181   : > { %s1961_s13 = smov %s1241_s19  ;;  %s1962_s14 = smov %s1232_s16 }
 0x182   :  { %12 = sbr.rel (!%p10_p10) target bundleno = 2 (0x2), region = 203 }

</bundles_post_ra>
